<compile_context>
chip_gen: v7x
topology: tpu7x:2x2x1
jax: 0.10.0
libtpu: 0.0.40
codegen_flags: <defaults>
</compile_context>

<pallas_src>
import functools

import jax
import jax.numpy as jnp
import numpy as np
from jax import lax
from jax.experimental import pallas as pl
from jax.experimental.pallas import tpu as pltpu


_SPECIAL_EXPONENTS = (1.0, 2.0, 0.5, 3.0, 4.0)


def _pow_static(x, t, log_x=None):
    """x ** t for a static Python float t; EUP only when strictly necessary."""
    t = float(t)
    if t == 1.0:
        return x
    if t == 2.0:
        return x * x
    if t == 3.0:
        return x * x * x
    if t == 4.0:
        x2 = x * x
        return x2 * x2
    if t == 0.5:
        return jnp.sqrt(x)                 # 1 EUP op
    if log_x is None:
        log_x = jnp.log(x)
    return jnp.exp(t * log_x)              # generic fallback


def _scales_kernel(pred_ref, targ_ref, scale_ref, *, ts):
    """Pass 1: per-row normalisation factors.

    Blocks: pred/targ (1, TILE_R, N_pad); scale out (1, TILE_R, nt).
    scale[j, p] = rsqrt(sum_k pred[j,k]**(2*ts[p])) * rsqrt(sum_k target[j,k]**2)
    """
    pred_t = pred_ref[0]                                   # (TILE_R, N_pad)
    targ_t = targ_ref[0]

    gt_rsq = lax.rsqrt(jnp.sum(targ_t * targ_t, axis=1, keepdims=True))   # (TILE_R, 1)

    # sum_j (pred**t)^2 == sum_j pred**(2t): build the squared power directly so the
    # t=0.5 case needs no EUP op here at all.  log is hoisted (once per tile) and only
    # traced if some exponent actually needs the exp(t*log(x)) path.
    need_log = any(float(2.0 * t) not in _SPECIAL_EXPONENTS for t in ts)
    log_p = jnp.log(pred_t) if need_log else None

    for p, t in enumerate(ts):                             # static unroll, nt is small
        pw_sq = _pow_static(pred_t, 2.0 * float(t), log_p)
        pr_rsq = lax.rsqrt(jnp.sum(pw_sq, axis=1, keepdims=True))         # (TILE_R, 1)
        scale_ref[0, :, p:p + 1] = pr_rsq * gt_rsq


def _loss_kernel(pred_ref, targ_ref, scale_ref, out_ref, *, ts):
    """Pass 2: per-pixel loss with min over exponents.

    Blocks: pred/targ (1, TILE_R, N_pad); scales (1, nt, N_pad); out (1, TILE_R, 1).
    """
    pred_t = pred_ref[0]                                   # (TILE_R, N_pad)
    targ_t = targ_ref[0]

    need_log = any(float(t) not in _SPECIAL_EXPONENTS for t in ts)
    log_p = jnp.log(pred_t) if need_log else None

    row_min = None
    for p, t in enumerate(ts):                             # static unroll
        pw = _pow_static(pred_t, t, log_p)
        prod = pw * targ_t                                 # (TILE_R, N_pad)
        s = scale_ref[0, p:p + 1, :]                       # (1, N_pad) lane vector
        # Exact-f32 VPU multiply by the lane-broadcast scale + lane reduce; avoids a
        # potentially multi-pass f32 MXU matvec and any in-kernel relayout.
        row_loss = -jnp.sum(prod * s, axis=1, keepdims=True)   # (TILE_R, 1)
        row_min = row_loss if row_min is None else jnp.minimum(row_min, row_loss)

    out_ref[0] = row_min


def _round_up(x, m):
    return ((x + m - 1) // m) * m


def _pick_tile_rows(n_pad):
    for cand in (512, 256, 128):
        if n_pad % cand == 0:
            return cand
    return 128  # unreachable: n_pad is always a multiple of 128


@functools.partial(jax.jit, static_argnames=("list_ts",))
def loss_kernel_matching_perpixel_ms(pred, target, list_ts):
    """pred, target: (bs, N, N) positive affinities.  list_ts: static tuple of floats.

    (The PyTorch module takes list_ts as a tensor of hyperparameter exponents; here it
    is consumed as static trace-time constants so the power can be special-cased.)
    """
    ts = tuple(float(t) for t in list_ts)
    nt = len(ts)
    bs, n, _ = pred.shape

    pred = pred.astype(jnp.float32)
    target = target.astype(jnp.float32)            # module does self.target.float()

    # ---- host-side padding to (8,128)-aligned square matrices --------------------
    n_pad = _round_up(n, 128)
    if n_pad != n:
        pad = n_pad - n
        # Padded columns are zero (real row norms / contractions unchanged); padded
        # rows carry a 1 on the diagonal so their norms stay finite -> no inf/NaN
        # anywhere, even for the padded region fed through the kernels.
        diag = jnp.pad(jnp.eye(pad, dtype=jnp.float32), ((n, 0), (n, 0)))[None]
        pred = jnp.pad(pred, ((0, 0), (0, pad), (0, pad))) + diag
        target = jnp.pad(target, ((0, 0), (0, pad), (0, pad))) + diag

    tile_r = _pick_tile_rows(n_pad)
    n_r = n_pad // tile_r

    # 32 MiB scoped VMEM: >= the default on every generation, far below v7x's 64 MiB
    # physical per-TC VMEM; the row-tiled working set is only ~15-20 MiB even at N~1700.
    cparams = pltpu.CompilerParams(
        dimension_semantics=("parallel", "parallel"),
        vmem_limit_bytes=32 * 1024 * 1024,
    )

    row_spec = pl.BlockSpec((1, tile_r, n_pad), lambda l, r: (l, r, 0))

    # ---- pass 1: per-row scale factors  scales[l, j, p] ---------------------------
    scales = pl.pallas_call(
        functools.partial(_scales_kernel, ts=ts),
        out_shape=jax.ShapeDtypeStruct((bs, n_pad, nt), jnp.float32),
        grid=(bs, n_r),
        in_specs=[row_spec, row_spec],
        out_specs=pl.BlockSpec((1, tile_r, nt), lambda l, r: (l, r, 0)),
        compiler_params=cparams,
    )(pred, target)

    # Tiny (bs, nt, N_pad) transpose done by XLA so pass 2 reads the scales as
    # lane-dense row vectors (no in-kernel sublane->lane relayout needed).
    scales_t = jnp.transpose(scales, (0, 2, 1))

    # ---- pass 2: per-pixel losses, min over exponents -----------------------------
    row_min = pl.pallas_call(
        functools.partial(_loss_kernel, ts=ts),
        out_shape=jax.ShapeDtypeStruct((bs, n_pad, 1), jnp.float32),
        grid=(bs, n_r),
        in_specs=[row_spec, row_spec,
                  pl.BlockSpec((1, nt, n_pad), lambda l, r: (l, 0, 0))],
        out_specs=pl.BlockSpec((1, tile_r, 1), lambda l, r: (l, r, 0)),
        compiler_params=cparams,
    )(pred, target, scales_t)

    # Drop padded rows, then the final scalar reduction.  1681 is hard-coded in the
    # PyTorch module.
    return jnp.sum(row_min[:, :n, 0]) / bs / 1681.0


def _reference(pred, target, ts):
    """Pure-JAX reference mirroring the PyTorch loops."""
    losses = []
    for t in ts:
        pw = pred ** t                                                   # (bs, n, n)
        no_pr = 1.0 / jnp.sqrt(jnp.sum(pw * pw, axis=2))                 # (bs, n)
        no_gt = 1.0 / jnp.sqrt(jnp.sum(target * target, axis=2))         # (bs, n)
        l = -jnp.sum(pw * target * (no_pr * no_gt)[:, None, :], axis=2)  # (bs, n)
        losses.append(l)
    losses = jnp.stack(losses, axis=1)                                   # (bs, nt, n)
    bs = pred.shape[0]
    return jnp.sum(jnp.min(losses, axis=1)) / bs / 1681.0


if __name__ == "__main__":
    key = jax.random.PRNGKey(0)
    k1, k2 = jax.random.split(key)

    bs, n = 2, 16          # small: 2 samples, 16 "pixels" -> 16x16 affinity matrices
    list_ts = (1.0, 2.0, 0.5)   # canonical exponent list (static)

    # Affinity-like strictly positive matrices (valid base for fractional powers).
    pred = jnp.exp(-jnp.square(jax.random.normal(k1, (bs, n, n), dtype=jnp.float32)))
    target = jnp.exp(-jnp.square(jax.random.normal(k2, (bs, n, n), dtype=jnp.float32)))

    out = loss_kernel_matching_perpixel_ms(pred, target, list_ts=list_ts)
    out = jax.block_until_ready(out)

    ref = jax.block_until_ready(_reference(pred, target, list_ts))
    np.testing.assert_allclose(np.asarray(out), np.asarray(ref), rtol=1e-3, atol=1e-5)

    print("KERNEL_OK")
</pallas_src>

<mosaic_0001>
module attributes {stable_mosaic.version = 11 : i64} {
  func.func @_scales_kernel(%arg0: i32, %arg1: i32, %arg2: memref<1x128x128xf32, #tpu.memory_space<vmem>>, %arg3: memref<1x128x128xf32, #tpu.memory_space<vmem>>, %arg4: memref<1x128x3xf32, #tpu.memory_space<vmem>>) attributes {dimension_semantics = [#tpu.dimension_semantics<parallel>, #tpu.dimension_semantics<parallel>], iteration_bounds = array<i64: 2, 1>, scalar_prefetch = 0 : i64, scratch_operands = 0 : i64, tpu.core_type = #tpu.core_type<tc>, window_params = [{transform_indices = @transform_0, window_bounds = array<i64: 1, 128, 128>}, {transform_indices = @transform_1, window_bounds = array<i64: 1, 128, 128>}, {transform_indices = @transform_2, window_bounds = array<i64: 1, 128, 3>}]} {
    %c0 = arith.constant 0 : index
    %c0_0 = arith.constant 0 : index
    %c0_1 = arith.constant 0 : index
    %0 = vector.load %arg2[%c0, %c0_0, %c0_1] : memref<1x128x128xf32, #tpu.memory_space<vmem>>, vector<1x128x128xf32>
    %1 = vector.shape_cast %0 : vector<1x128x128xf32> to vector<128x128xf32>
    %c0_2 = arith.constant 0 : index
    %c0_3 = arith.constant 0 : index
    %c0_4 = arith.constant 0 : index
    %2 = vector.load %arg3[%c0_2, %c0_3, %c0_4] : memref<1x128x128xf32, #tpu.memory_space<vmem>>, vector<1x128x128xf32>
    %3 = vector.shape_cast %2 : vector<1x128x128xf32> to vector<128x128xf32>
    %4 = arith.mulf %3, %3 : vector<128x128xf32>
    %cst = arith.constant dense<0.000000e+00> : vector<128xf32>
    %5 = vector.multi_reduction <add>, %4, %cst [1] : vector<128x128xf32> to vector<128xf32>
    %6 = vector.shape_cast %5 : vector<128xf32> to vector<128x1xf32>
    %7 = math.rsqrt %6 : vector<128x1xf32>
    %8 = arith.mulf %1, %1 : vector<128x128xf32>
    %cst_5 = arith.constant dense<0.000000e+00> : vector<128xf32>
    %9 = vector.multi_reduction <add>, %8, %cst_5 [1] : vector<128x128xf32> to vector<128xf32>
    %10 = vector.shape_cast %9 : vector<128xf32> to vector<128x1xf32>
    %11 = math.rsqrt %10 : vector<128x1xf32>
    %12 = arith.mulf %11, %7 : vector<128x1xf32>
    %c0_6 = arith.constant 0 : index
    %c0_7 = arith.constant 0 : index
    %c0_8 = arith.constant 0 : index
    %13 = vector.load %arg4[%c0_6, %c0_7, %c0_8] : memref<1x128x3xf32, #tpu.memory_space<vmem>>, vector<1x128x1xf32>
    %14 = vector.shape_cast %13 : vector<1x128x1xf32> to vector<128x1xf32>
    %15 = vector.shape_cast %12 : vector<128x1xf32> to vector<1x128x1xf32>
    tpu.vector_store %arg4[%c0_6, %c0_7, %c0_8], %15 {strides = array<i32>} : memref<1x128x3xf32, #tpu.memory_space<vmem>>, vector<1x128x1xf32>,
    %16 = arith.mulf %1, %1 : vector<128x128xf32>
    %17 = arith.mulf %16, %16 : vector<128x128xf32>
    %cst_9 = arith.constant dense<0.000000e+00> : vector<128xf32>
    %18 = vector.multi_reduction <add>, %17, %cst_9 [1] : vector<128x128xf32> to vector<128xf32>
    %19 = vector.shape_cast %18 : vector<128xf32> to vector<128x1xf32>
    %20 = math.rsqrt %19 : vector<128x1xf32>
    %21 = arith.mulf %20, %7 : vector<128x1xf32>
    %c0_10 = arith.constant 0 : index
    %c0_11 = arith.constant 0 : index
    %c1 = arith.constant 1 : index
    %22 = vector.load %arg4[%c0_10, %c0_11, %c1] : memref<1x128x3xf32, #tpu.memory_space<vmem>>, vector<1x128x1xf32>
    %23 = vector.shape_cast %22 : vector<1x128x1xf32> to vector<128x1xf32>
    %24 = vector.shape_cast %21 : vector<128x1xf32> to vector<1x128x1xf32>
    tpu.vector_store %arg4[%c0_10, %c0_11, %c1], %24 {strides = array<i32>} : memref<1x128x3xf32, #tpu.memory_space<vmem>>, vector<1x128x1xf32>,
    %cst_12 = arith.constant dense<0.000000e+00> : vector<128xf32>
    %25 = vector.multi_reduction <add>, %1, %cst_12 [1] : vector<128x128xf32> to vector<128xf32>
    %26 = vector.shape_cast %25 : vector<128xf32> to vector<128x1xf32>
    %27 = math.rsqrt %26 : vector<128x1xf32>
    %28 = arith.mulf %27, %7 : vector<128x1xf32>
    %c0_13 = arith.constant 0 : index
    %c0_14 = arith.constant 0 : index
    %c2 = arith.constant 2 : index
    %29 = vector.load %arg4[%c0_13, %c0_14, %c2] : memref<1x128x3xf32, #tpu.memory_space<vmem>>, vector<1x128x1xf32>
    %30 = vector.shape_cast %29 : vector<1x128x1xf32> to vector<128x1xf32>
    %31 = vector.shape_cast %28 : vector<128x1xf32> to vector<1x128x1xf32>
    tpu.vector_store %arg4[%c0_13, %c0_14, %c2], %31 {strides = array<i32>} : memref<1x128x3xf32, #tpu.memory_space<vmem>>, vector<1x128x1xf32>,
    return
  }
  func.func @transform_0(%arg0: i32, %arg1: i32) -> (i32, i32, i32) {
    %c0_i32 = arith.constant 0 : i32
    %c0_i32_0 = arith.constant 0 : i32
    return %arg0, %arg1, %c0_i32 : i32, i32, i32
  }
  func.func @transform_1(%arg0: i32, %arg1: i32) -> (i32, i32, i32) {
    %c0_i32 = arith.constant 0 : i32
    %c0_i32_0 = arith.constant 0 : i32
    return %arg0, %arg1, %c0_i32 : i32, i32, i32
  }
  func.func @transform_2(%arg0: i32, %arg1: i32) -> (i32, i32, i32) {
    %c0_i32 = arith.constant 0 : i32
    %c0_i32_0 = arith.constant 0 : i32
    return %arg0, %arg1, %c0_i32 : i32, i32, i32
  }
}

module attributes {stable_mosaic.version = 11 : i64} {
  func.func @_loss_kernel(%arg0: i32, %arg1: i32, %arg2: memref<1x128x128xf32, #tpu.memory_space<vmem>>, %arg3: memref<1x128x128xf32, #tpu.memory_space<vmem>>, %arg4: memref<1x3x128xf32, #tpu.memory_space<vmem>>, %arg5: memref<1x128x1xf32, #tpu.memory_space<vmem>>) attributes {dimension_semantics = [#tpu.dimension_semantics<parallel>, #tpu.dimension_semantics<parallel>], iteration_bounds = array<i64: 2, 1>, scalar_prefetch = 0 : i64, scratch_operands = 0 : i64, tpu.core_type = #tpu.core_type<tc>, window_params = [{transform_indices = @transform_0, window_bounds = array<i64: 1, 128, 128>}, {transform_indices = @transform_1, window_bounds = array<i64: 1, 128, 128>}, {transform_indices = @transform_2, window_bounds = array<i64: 1, 3, 128>}, {transform_indices = @transform_3, window_bounds = array<i64: 1, 128, 1>}]} {
    %c0 = arith.constant 0 : index
    %c0_0 = arith.constant 0 : index
    %c0_1 = arith.constant 0 : index
    %0 = vector.load %arg2[%c0, %c0_0, %c0_1] : memref<1x128x128xf32, #tpu.memory_space<vmem>>, vector<1x128x128xf32>
    %1 = vector.shape_cast %0 : vector<1x128x128xf32> to vector<128x128xf32>
    %c0_2 = arith.constant 0 : index
    %c0_3 = arith.constant 0 : index
    %c0_4 = arith.constant 0 : index
    %2 = vector.load %arg3[%c0_2, %c0_3, %c0_4] : memref<1x128x128xf32, #tpu.memory_space<vmem>>, vector<1x128x128xf32>
    %3 = vector.shape_cast %2 : vector<1x128x128xf32> to vector<128x128xf32>
    %4 = arith.mulf %1, %3 : vector<128x128xf32>
    %c0_5 = arith.constant 0 : index
    %c0_6 = arith.constant 0 : index
    %c0_7 = arith.constant 0 : index
    %5 = vector.load %arg4[%c0_5, %c0_6, %c0_7] : memref<1x3x128xf32, #tpu.memory_space<vmem>>, vector<1x1x128xf32>
    %6 = vector.shape_cast %5 : vector<1x1x128xf32> to vector<1x128xf32>
    %7 = vector.broadcast %6 : vector<1x128xf32> to vector<128x128xf32>
    %8 = arith.mulf %4, %7 : vector<128x128xf32>
    %cst = arith.constant dense<0.000000e+00> : vector<128xf32>
    %9 = vector.multi_reduction <add>, %8, %cst [1] : vector<128x128xf32> to vector<128xf32>
    %10 = vector.shape_cast %9 : vector<128xf32> to vector<128x1xf32>
    %cst_8 = arith.constant 0.000000e+00 : f32
    %11 = vector.broadcast %cst_8 : f32 to vector<128x1xf32>
    %12 = arith.subf %11, %10 : vector<128x1xf32>
    %13 = arith.mulf %1, %1 : vector<128x128xf32>
    %14 = arith.mulf %13, %3 : vector<128x128xf32>
    %c0_9 = arith.constant 0 : index
    %c1 = arith.constant 1 : index
    %c0_10 = arith.constant 0 : index
    %15 = vector.load %arg4[%c0_9, %c1, %c0_10] : memref<1x3x128xf32, #tpu.memory_space<vmem>>, vector<1x1x128xf32>
    %16 = vector.shape_cast %15 : vector<1x1x128xf32> to vector<1x128xf32>
    %17 = vector.broadcast %16 : vector<1x128xf32> to vector<128x128xf32>
    %18 = arith.mulf %14, %17 : vector<128x128xf32>
    %cst_11 = arith.constant dense<0.000000e+00> : vector<128xf32>
    %19 = vector.multi_reduction <add>, %18, %cst_11 [1] : vector<128x128xf32> to vector<128xf32>
    %20 = vector.shape_cast %19 : vector<128xf32> to vector<128x1xf32>
    %cst_12 = arith.constant 0.000000e+00 : f32
    %21 = vector.broadcast %cst_12 : f32 to vector<128x1xf32>
    %22 = arith.subf %21, %20 : vector<128x1xf32>
    %23 = arith.minimumf %12, %22 : vector<128x1xf32>
    %24 = math.sqrt %1 : vector<128x128xf32>
    %25 = arith.mulf %24, %3 : vector<128x128xf32>
    %c0_13 = arith.constant 0 : index
    %c2 = arith.constant 2 : index
    %c0_14 = arith.constant 0 : index
    %26 = vector.load %arg4[%c0_13, %c2, %c0_14] : memref<1x3x128xf32, #tpu.memory_space<vmem>>, vector<1x1x128xf32>
    %27 = vector.shape_cast %26 : vector<1x1x128xf32> to vector<1x128xf32>
    %28 = vector.broadcast %27 : vector<1x128xf32> to vector<128x128xf32>
    %29 = arith.mulf %25, %28 : vector<128x128xf32>
    %cst_15 = arith.constant dense<0.000000e+00> : vector<128xf32>
    %30 = vector.multi_reduction <add>, %29, %cst_15 [1] : vector<128x128xf32> to vector<128xf32>
    %31 = vector.shape_cast %30 : vector<128xf32> to vector<128x1xf32>
    %cst_16 = arith.constant 0.000000e+00 : f32
    %32 = vector.broadcast %cst_16 : f32 to vector<128x1xf32>
    %33 = arith.subf %32, %31 : vector<128x1xf32>
    %34 = arith.minimumf %23, %33 : vector<128x1xf32>
    %c0_17 = arith.constant 0 : index
    %c0_18 = arith.constant 0 : index
    %c0_19 = arith.constant 0 : index
    %35 = vector.load %arg5[%c0_17, %c0_18, %c0_19] : memref<1x128x1xf32, #tpu.memory_space<vmem>>, vector<1x128x1xf32>
    %36 = vector.shape_cast %35 : vector<1x128x1xf32> to vector<128x1xf32>
    %37 = vector.shape_cast %34 : vector<128x1xf32> to vector<1x128x1xf32>
    tpu.vector_store %arg5[%c0_17, %c0_18, %c0_19], %37 {strides = array<i32>} : memref<1x128x1xf32, #tpu.memory_space<vmem>>, vector<1x128x1xf32>,
    return
  }
  func.func @transform_0(%arg0: i32, %arg1: i32) -> (i32, i32, i32) {
    %c0_i32 = arith.constant 0 : i32
    %c0_i32_0 = arith.constant 0 : i32
    return %arg0, %arg1, %c0_i32 : i32, i32, i32
  }
  func.func @transform_1(%arg0: i32, %arg1: i32) -> (i32, i32, i32) {
    %c0_i32 = arith.constant 0 : i32
    %c0_i32_0 = arith.constant 0 : i32
    return %arg0, %arg1, %c0_i32 : i32, i32, i32
  }
  func.func @transform_2(%arg0: i32, %arg1: i32) -> (i32, i32, i32) {
    %c0_i32 = arith.constant 0 : i32
    %c0_i32_0 = arith.constant 0 : i32
    %c0_i32_1 = arith.constant 0 : i32
    return %arg0, %c0_i32, %c0_i32_0 : i32, i32, i32
  }
  func.func @transform_3(%arg0: i32, %arg1: i32) -> (i32, i32, i32) {
    %c0_i32 = arith.constant 0 : i32
    %c0_i32_0 = arith.constant 0 : i32
    return %arg0, %arg1, %c0_i32 : i32, i32, i32
  }
}

</mosaic_0001>

<bundles_post_ra>
// kernel: loss_kernel_matching_perpixel_ms.2
= control target key start
LH: loop header
LB: loop body
LE: loop exit
PB: predicated region body
PF: predicated region fallthrough
CT: control target
= control target key end

     0   :  { %s902_s9 = smov 0   ;;  %s904_s10 = smov 0   ;;  %s1219_s0 = inlined_call_operand.vmem [shape: f32[2,128,128], index: 0, kind: input, shape index: {}]   ;;  %s1220_s1 = inlined_call_operand.vmem [shape: f32[2,128,128], index: 1, kind: input, shape index: {}]   ;;  %s1221_s2 = inlined_call_operand.vmem [shape: f32[2,128,3], index: 2, kind: output, shape index: {}]  }
   0x1   :  { %s906_s11 = smov 0  }
   0x2 LB: > { %s24_s12 = sadd.s32 1, %s881_s10  ;;  %p699_p0 = scmp.ge.s32.totalorder %s885_s11, 1  ;;  %s885_s11 = sphi %s906_s11, %s12_s11   ;;  %s881_s10 = sphi %s904_s10, %s1223_s10   ;;  %s877_s9 = sphi %s902_s9, %s1222_s9  }
   0x3   : > { %p26_p1 = scmp.ge.s32.totalorder %s24_s12, 2  ;;  %p150_p2 = scmp.lt.s32.totalorder %s885_s11, 3 }
   0x5   : > { %s1225_s12 = smov (%p26_p1, %s24_s12), 0  ;;  %p151_p3 = pnand %p699_p0, %p150_p2 }
   0x6   : > { %p190_p4 = scmp.lt.s32.totalorder (!%p151_p3), %s877_s9, 1  ;;  %vm395_vm0 = vcmask (!%p151_p3), 7168   ;;  %vm492_vm1 = vcmask (!%p151_p3), 15368   ;;  %vm573_vm2 = vcmask (!%p151_p3), 23568  }
   0x7   : > { %154 = sbr.rel (%p151_p3) target bundleno = 301 (0x12d), region = 28 }
   0xe   : > { %s1227_s9 = smov (!%p190_p4, %s877_s9), 1 }
   0xf   : > { %s920_s13 = sshll.u32 %s1227_s9, 7 }
  0x10   : > { %s926_s16 = scalar_lea.vmem %s1220_s1, %s920_s13  ;;  %s948_s19 = scalar_lea.vmem %s1219_s0, %s920_s13 }
  0x11   : > { %v237_v0 = vld [vmem:[%s926_s16 + $0x10] sm:$0xff]  ;;  %v235_v1 = vld [vmem:[%s926_s16] sm:$0xff]  ;;  %v238_v2 = vld [vmem:[%s926_s16 + $0x18] sm:$0xff]  ;;  %s1032_s22 = scalar_lea.vmem %s1221_s2, %s920_s13 }
  0x12   : > { %v253_v3 = vmul.f32 %v237_v0, %v237_v0  ;;  %v251_v4 = vmul.f32 %v235_v1, %v235_v1  ;;  %v236_v5 = vld [vmem:[%s926_s16 + $0x8] sm:$0xff]  ;;  %v254_v6 = vmul.f32 %v238_v2, %v238_v2  ;;  %v239_v9 = vld [vmem:[%s926_s16 + $0x20] sm:$0xff]  ;;  %v242_v12 = vld [vmem:[%s926_s16 + $0x38] sm:$0xff] }
  0x13   : > { %v252_v7 = vmul.f32 %v236_v5, %v236_v5  ;;  %v240_v8 = vld [vmem:[%s926_s16 + $0x28] sm:$0xff]  ;;  %v255_v11 = vmul.f32 %v239_v9, %v239_v9  ;;  %v241_v13 = vld [vmem:[%s926_s16 + $0x30] sm:$0xff]  ;;  %v258_v14 = vmul.f32 %v242_v12, %v242_v12  ;;  %v243_v17 = vld [vmem:[%s926_s16 + $0x40] sm:$0xff] }
  0x14   : > { %271 = vadd.xlane.f32.xlu1 %v253_v3  ;;  %267 = vadd.xlane.f32.xlu0 %v251_v4  ;;  %v256_v10 = vmul.f32 %v240_v8, %v240_v8  ;;  %v257_v15 = vmul.f32 %v241_v13, %v241_v13  ;;  %v244_v16 = vld [vmem:[%s926_s16 + $0x48] sm:$0xff]  ;;  %v259_v19 = vmul.f32 %v243_v17, %v243_v17  ;;  %v246_v20 = vld [vmem:[%s926_s16 + $0x58] sm:$0xff]  ;;  %v245_v21 = vld [vmem:[%s926_s16 + $0x50] sm:$0xff] }
  0x15   : > { %v260_v18 = vmul.f32 %v244_v16, %v244_v16  ;;  %v262_v22 = vmul.f32 %v246_v20, %v246_v20  ;;  %v261_v23 = vmul.f32 %v245_v21, %v245_v21  ;;  %v248_v24 = vld [vmem:[%s926_s16 + $0x68] sm:$0xff]  ;;  %v247_v25 = vld [vmem:[%s926_s16 + $0x60] sm:$0xff]  ;;  %v250_v28 = vld [vmem:[%s926_s16 + $0x78] sm:$0xff] }
  0x16   : > { %v264_v26 = vmul.f32 %v248_v24, %v248_v24  ;;  %v263_v27 = vmul.f32 %v247_v25, %v247_v25  ;;  %v249_v29 = vld [vmem:[%s926_s16 + $0x70] sm:$0xff]  ;;  %v266_v30 = vmul.f32 %v250_v28, %v250_v28  ;;  %v951_v32 = vld [vmem:[%s948_s19 + $0x8] sm:$0xff]  ;;  %v954_v33 = vld [vmem:[%s948_s19] sm:$0xff] }
  0x17   : > { %v265_v31 = vmul.f32 %v249_v29, %v249_v29  ;;  %v316_v34 = vmul.f32 %v951_v32, %v951_v32  ;;  %v315_v35 = vmul.f32 %v954_v33, %v954_v33  ;;  %v961_v36 = vld [vmem:[%s948_s19 + $0x18] sm:$0xff]  ;;  %v964_v37 = vld [vmem:[%s948_s19 + $0x10] sm:$0xff]  ;;  %v971_v40 = vld [vmem:[%s948_s19 + $0x28] sm:$0xff] }
  0x18   : > { %273 = vadd.xlane.f32.xlu1 %v254_v6  ;;  %269 = vadd.xlane.f32.xlu0 %v252_v7  ;;  %v318_v38 = vmul.f32 %v961_v36, %v961_v36  ;;  %v317_v39 = vmul.f32 %v964_v37, %v964_v37  ;;  %v974_v41 = vld [vmem:[%s948_s19 + $0x20] sm:$0xff]  ;;  %v320_v42 = vmul.f32 %v971_v40, %v971_v40  ;;  %v981_v44 = vld [vmem:[%s948_s19 + $0x38] sm:$0xff]  ;;  %v984_v45 = vld [vmem:[%s948_s19 + $0x30] sm:$0xff] }
  0x19   : > { %v319_v43 = vmul.f32 %v974_v41, %v974_v41  ;;  %v322_v46 = vmul.f32 %v981_v44, %v981_v44  ;;  %v321_v47 = vmul.f32 %v984_v45, %v984_v45  ;;  %v991_v48 = vld [vmem:[%s948_s19 + $0x48] sm:$0xff]  ;;  %v994_v49 = vld [vmem:[%s948_s19 + $0x40] sm:$0xff]  ;;  %v230_v52 = vld [vmem:[%s948_s19 + $0x58] sm:$0xff]  ;;  %v413_v0 = vmul.f32 %v316_v34, %v316_v34 }
  0x1a   : > { %v324_v50 = vmul.f32 %v991_v48, %v991_v48  ;;  %v323_v51 = vmul.f32 %v994_v49, %v994_v49  ;;  %v229_v53 = vld [vmem:[%s948_s19 + $0x50] sm:$0xff]  ;;  %v326_v54 = vmul.f32 %v230_v52, %v230_v52  ;;  %v232_v56 = vld [vmem:[%s948_s19 + $0x68] sm:$0xff]  ;;  %v231_v57 = vld [vmem:[%s948_s19 + $0x60] sm:$0xff]  ;;  %v412_v1 = vmul.f32 %v315_v35, %v315_v35 }
  0x1b   : > { %v325_v55 = vmul.f32 %v229_v53, %v229_v53  ;;  %v328_v58 = vmul.f32 %v232_v56, %v232_v56  ;;  %v327_v59 = vmul.f32 %v231_v57, %v231_v57  ;;  %v234_v60 = vld [vmem:[%s948_s19 + $0x78] sm:$0xff]  ;;  %v233_v61 = vld [vmem:[%s948_s19 + $0x70] sm:$0xff]  ;;  %v415_v2 = vmul.f32 %v318_v38, %v318_v38 }
  0x1c   : > { %277 = vadd.xlane.f32.xlu1 %v256_v10  ;;  %275 = vadd.xlane.f32.xlu0 %v255_v11  ;;  %v330_v62 = vmul.f32 %v234_v60, %v234_v60  ;;  %v329_v63 = vmul.f32 %v233_v61, %v233_v61  ;;  %v414_v3 = vmul.f32 %v317_v39, %v317_v39 }
  0x1d   : > { %v417_v4 = vmul.f32 %v320_v42, %v320_v42  ;;  %v416_v5 = vmul.f32 %v319_v43, %v319_v43  ;;  %v419_v6 = vmul.f32 %v322_v46, %v322_v46  ;;  %v418_v7 = vmul.f32 %v321_v47, %v321_v47 }
  0x1e   : > { %v421_v8 = vmul.f32 %v324_v50, %v324_v50  ;;  %v420_v9 = vmul.f32 %v323_v51, %v323_v51  ;;  %v423_v10 = vmul.f32 %v326_v54, %v326_v54  ;;  %v422_v11 = vmul.f32 %v325_v55, %v325_v55 }
  0x1f   : > { %v425_v12 = vmul.f32 %v328_v58, %v328_v58  ;;  %v424_v13 = vmul.f32 %v327_v59, %v327_v59 }
  0x20   : > { %281 = vadd.xlane.f32.xlu1 %v258_v14  ;;  %279 = vadd.xlane.f32.xlu0 %v257_v15  ;;  %v427_v14 = vmul.f32 %v330_v62, %v330_v62  ;;  %v426_v15 = vmul.f32 %v329_v63, %v329_v63 }
  0x24   : > { %285 = vadd.xlane.f32.xlu1 %v260_v18  ;;  %283 = vadd.xlane.f32.xlu0 %v259_v19 }
  0x28   : > { %289 = vadd.xlane.f32.xlu1 %v262_v22  ;;  %287 = vadd.xlane.f32.xlu0 %v261_v23 }
  0x2c   : > { %293 = vadd.xlane.f32.xlu1 %v264_v26  ;;  %291 = vadd.xlane.f32.xlu0 %v263_v27 }
  0x30   : > { %297 = vadd.xlane.f32.xlu1 %v266_v30  ;;  %295 = vadd.xlane.f32.xlu0 %v265_v31 }
  0x34   : > { %333 = vadd.xlane.f32.xlu1 %v316_v34  ;;  %331 = vadd.xlane.f32.xlu0 %v315_v35 }
  0x38   : > { %337 = vadd.xlane.f32.xlu1 %v318_v38  ;;  %335 = vadd.xlane.f32.xlu0 %v317_v39 }
  0x3c   : > { %341 = vadd.xlane.f32.xlu1 %v320_v42  ;;  %339 = vadd.xlane.f32.xlu0 %v319_v43 }
  0x40   : > { %345 = vadd.xlane.f32.xlu1 %v322_v46  ;;  %343 = vadd.xlane.f32.xlu0 %v321_v47 }
  0x44   : > { %349 = vadd.xlane.f32.xlu1 %v324_v50  ;;  %347 = vadd.xlane.f32.xlu0 %v323_v51 }
  0x48   : > { %353 = vadd.xlane.f32.xlu1 %v326_v54  ;;  %351 = vadd.xlane.f32.xlu0 %v325_v55 }
  0x4c   : > { %357 = vadd.xlane.f32.xlu1 %v328_v58  ;;  %355 = vadd.xlane.f32.xlu0 %v327_v59 }
  0x50   : > { %361 = vadd.xlane.f32.xlu1 %v330_v62  ;;  %359 = vadd.xlane.f32.xlu0 %v329_v63 }
  0x54   : > { %430 = vadd.xlane.f32.xlu1 %v413_v0  ;;  %428 = vadd.xlane.f32.xlu0 %v412_v1 }
  0x58   : > { %434 = vadd.xlane.f32.xlu1 %v415_v2  ;;  %432 = vadd.xlane.f32.xlu0 %v414_v3 }
  0x5c   : > { %438 = vadd.xlane.f32.xlu1 %v417_v4  ;;  %436 = vadd.xlane.f32.xlu0 %v416_v5 }
  0x60   : > { %442 = vadd.xlane.f32.xlu1 %v419_v6  ;;  %440 = vadd.xlane.f32.xlu0 %v418_v7 }
  0x64   : > { %446 = vadd.xlane.f32.xlu1 %v421_v8  ;;  %444 = vadd.xlane.f32.xlu0 %v420_v9 }
  0x68   : > { %450 = vadd.xlane.f32.xlu1 %v423_v10  ;;  %448 = vadd.xlane.f32.xlu0 %v422_v11 }
  0x6c   : > { %454 = vadd.xlane.f32.xlu1 %v425_v12  ;;  %452 = vadd.xlane.f32.xlu0 %v424_v13 }
  0x70   : > { %458 = vadd.xlane.f32.xlu1 %v427_v14  ;;  %456 = vadd.xlane.f32.xlu0 %v426_v15 }
  0x74   : > { %511 = vadd.xlane.f32.xlu1 %v951_v32  ;;  %509 = vadd.xlane.f32.xlu0 %v954_v33 }
  0x78   : > { %515 = vadd.xlane.f32.xlu1 %v961_v36  ;;  %513 = vadd.xlane.f32.xlu0 %v964_v37 }
  0x7c   : > { %519 = vadd.xlane.f32.xlu1 %v971_v40  ;;  %517 = vadd.xlane.f32.xlu0 %v974_v41 }
  0x80   : > { %523 = vadd.xlane.f32.xlu1 %v981_v44  ;;  %521 = vadd.xlane.f32.xlu0 %v984_v45 }
  0x84   : > { %527 = vadd.xlane.f32.xlu1 %v991_v48  ;;  %525 = vadd.xlane.f32.xlu0 %v994_v49 }
  0x88   : > { %531 = vadd.xlane.f32.xlu1 %v230_v52  ;;  %529 = vadd.xlane.f32.xlu0 %v229_v53 }
  0x8c   : > { %535 = vadd.xlane.f32.xlu1 %v232_v56  ;;  %533 = vadd.xlane.f32.xlu0 %v231_v57 }
  0x90   : > { %539 = vadd.xlane.f32.xlu1 %v234_v60  ;;  %537 = vadd.xlane.f32.xlu0 %v233_v61 }
  0xa1   : > { %v272_v16 = vpop.xlane.xlu1 %271  ;;  %v268_v17 = vpop.xlane.xlu0 %267 }
  0xa2   : > { %735 = vrsqrt.f32 %v268_v17 }
  0xa5   : > { %v274_v18 = vpop.xlane.xlu1 %273  ;;  %v270_v19 = vpop.xlane.xlu0 %269 }
  0xa6   : > { %737 = vrsqrt.f32 %v270_v19 }
  0xa9   : > { %v278_v20 = vpop.xlane.xlu1 %277  ;;  %v276_v21 = vpop.xlane.xlu0 %275 }
  0xac   : > { %v1024_v38 = vpop.eup %735 }
  0xad   : > { %v282_v22 = vpop.xlane.xlu1 %281  ;;  %v280_v23 = vpop.xlane.xlu0 %279 }
  0xb0   : > { %v1026_v39 = vpop.eup %737 }
  0xb1   : > { %v286_v24 = vpop.xlane.xlu1 %285  ;;  %v284_v25 = vpop.xlane.xlu0 %283 }
  0xb5   : > { %v290_v26 = vpop.xlane.xlu1 %289  ;;  %v288_v27 = vpop.xlane.xlu0 %287 }
  0xb9   : > { %v1016_v28 = vpop.xlane.xlu1 %293  ;;  %v1018_v29 = vpop.xlane.xlu0 %291 }
  0xbd   : > { %v1020_v30 = vpop.xlane.xlu1 %297  ;;  %v1022_v31 = vpop.xlane.xlu0 %295 }
  0xc1   : > { %v334_v32 = vpop.xlane.xlu1 %333  ;;  %v332_v33 = vpop.xlane.xlu0 %331 }
  0xc2   : > { %739 = vrsqrt.f32 %v334_v32 }
  0xc3   : > { %741 = vrsqrt.f32 %v332_v33 }
  0xc4   : > { %743 = vrsqrt.f32 %v272_v16 }
  0xc5   : > { %745 = vrsqrt.f32 %v274_v18  ;;  %v338_v34 = vpop.xlane.xlu1 %337  ;;  %v336_v35 = vpop.xlane.xlu0 %335 }
  0xc6   : > { %747 = vrsqrt.f32 %v338_v34 }
  0xc7   : > { %749 = vrsqrt.f32 %v336_v35 }
  0xc8   : > { %751 = vrsqrt.f32 %v278_v20 }
  0xc9   : > { %753 = vrsqrt.f32 %v276_v21  ;;  %v342_v36 = vpop.xlane.xlu1 %341  ;;  %v340_v37 = vpop.xlane.xlu0 %339 }
  0xca   : > { %755 = vrsqrt.f32 %v342_v36 }
  0xcb   : > { %757 = vrsqrt.f32 %v340_v37 }
  0xcc   : > { %v740_v40 = vpop.eup %739  ;;  %759 = vrsqrt.f32 %v282_v22 }
  0xcd   : > { %v742_v41 = vpop.eup %741  ;;  %761 = vrsqrt.f32 %v280_v23  ;;  %v380_v42 = vmul.f32 %v740_v40, %v1026_v39  ;;  %v346_v43 = vpop.xlane.xlu1 %345 }
  0xce   : > { %v344_v44 = vpop.xlane.xlu0 %343  ;;  %v1035_v45 = vpop.eup %743  ;;  %v379_v46 = vmul.f32 %v742_v41, %v1024_v38  ;;  %763 = vrsqrt.f32 %v346_v43 }
  0xcf   : > { %v1038_v47 = vpop.eup %745  ;;  %397 = vst.msk [vmem:[%s1032_s22 + $0x8] sm:$0xff] %vm395_vm0, %v380_v42  ;;  %765 = vrsqrt.f32 %v344_v44 }
  0xd0   : > { %v748_v48 = vpop.eup %747  ;;  %767 = vrsqrt.f32 %v286_v24  ;;  %396 = vst.msk [vmem:[%s1032_s22] sm:$0xff] %vm395_vm0, %v379_v46 }
  0xd1   : > { %v750_v49 = vpop.eup %749  ;;  %769 = vrsqrt.f32 %v284_v25  ;;  %v382_v50 = vmul.f32 %v748_v48, %v1038_v47  ;;  %v350_v51 = vpop.xlane.xlu1 %349 }
  0xd2   : > { %v348_v52 = vpop.xlane.xlu0 %347  ;;  %v1045_v53 = vpop.eup %751  ;;  %v381_v54 = vmul.f32 %v750_v49, %v1035_v45  ;;  %771 = vrsqrt.f32 %v350_v51 }
  0xd3   : > { %v1048_v55 = vpop.eup %753  ;;  %399 = vst.msk [vmem:[%s1032_s22 + $0x18] sm:$0xff] %vm395_vm0, %v382_v50  ;;  %773 = vrsqrt.f32 %v348_v52 }
  0xd4   : > { %v756_v56 = vpop.eup %755  ;;  %775 = vrsqrt.f32 %v290_v26  ;;  %398 = vst.msk [vmem:[%s1032_s22 + $0x10] sm:$0xff] %vm395_vm0, %v381_v54 }
  0xd5   : > { %v758_v57 = vpop.eup %757  ;;  %777 = vrsqrt.f32 %v288_v27  ;;  %v384_v58 = vmul.f32 %v756_v56, %v1045_v53  ;;  %v354_v59 = vpop.xlane.xlu1 %353 }
  0xd6   : > { %v352_v60 = vpop.xlane.xlu0 %351  ;;  %v1055_v61 = vpop.eup %759  ;;  %v383_v62 = vmul.f32 %v758_v57, %v1048_v55  ;;  %779 = vrsqrt.f32 %v354_v59 }
  0xd7   : > { %v1058_v63 = vpop.eup %761  ;;  %401 = vst.msk [vmem:[%s1032_s22 + $0x28] sm:$0xff] %vm395_vm0, %v384_v58  ;;  %781 = vrsqrt.f32 %v352_v60 }
  0xd8   : > { %v764_v0 = vpop.eup %763  ;;  %783 = vrsqrt.f32 %v1016_v28  ;;  %400 = vst.msk [vmem:[%s1032_s22 + $0x20] sm:$0xff] %vm395_vm0, %v383_v62 }
  0xd9   : > { %v766_v1 = vpop.eup %765  ;;  %785 = vrsqrt.f32 %v1018_v29  ;;  %v386_v2 = vmul.f32 %v764_v0, %v1055_v61  ;;  %v358_v3 = vpop.xlane.xlu1 %357 }
  0xda   : > { %v356_v4 = vpop.xlane.xlu0 %355  ;;  %v1067_v5 = vpop.eup %767  ;;  %v385_v6 = vmul.f32 %v766_v1, %v1058_v63  ;;  %787 = vrsqrt.f32 %v358_v3 }
  0xdb   : > { %v1070_v7 = vpop.eup %769  ;;  %403 = vst.msk [vmem:[%s1032_s22 + $0x38] sm:$0xff] %vm395_vm0, %v386_v2  ;;  %789 = vrsqrt.f32 %v356_v4 }
  0xdc   : > { %v772_v8 = vpop.eup %771  ;;  %791 = vrsqrt.f32 %v1020_v30  ;;  %402 = vst.msk [vmem:[%s1032_s22 + $0x30] sm:$0xff] %vm395_vm0, %v385_v6 }
  0xdd   : > { %v774_v9 = vpop.eup %773  ;;  %793 = vrsqrt.f32 %v1022_v31  ;;  %v388_v10 = vmul.f32 %v772_v8, %v1067_v5  ;;  %v362_v11 = vpop.xlane.xlu1 %361 }
  0xde   : > { %v360_v12 = vpop.xlane.xlu0 %359  ;;  %v1079_v13 = vpop.eup %775  ;;  %v387_v14 = vmul.f32 %v774_v9, %v1070_v7  ;;  %795 = vrsqrt.f32 %v362_v11 }
  0xdf   : > { %v1082_v15 = vpop.eup %777  ;;  %405 = vst.msk [vmem:[%s1032_s22 + $0x48] sm:$0xff] %vm395_vm0, %v388_v10  ;;  %797 = vrsqrt.f32 %v360_v12 }
  0xe0   : > { %v780_v16 = vpop.eup %779  ;;  %404 = vst.msk [vmem:[%s1032_s22 + $0x40] sm:$0xff] %vm395_vm0, %v387_v14 }
  0xe1   : > { %v782_v17 = vpop.eup %781  ;;  %v390_v18 = vmul.f32 %v780_v16, %v1079_v13  ;;  %v431_v19 = vpop.xlane.xlu1 %430 }
  0xe2   : > { %v429_v20 = vpop.xlane.xlu0 %428  ;;  %v1089_v21 = vpop.eup %783  ;;  %v389_v22 = vmul.f32 %v782_v17, %v1082_v15  ;;  %799 = vrsqrt.f32 %v431_v19 }
  0xe3   : > { %v1092_v23 = vpop.eup %785  ;;  %407 = vst.msk [vmem:[%s1032_s22 + $0x58] sm:$0xff] %vm395_vm0, %v390_v18  ;;  %801 = vrsqrt.f32 %v429_v20 }
  0xe4   : > { %v788_v24 = vpop.eup %787  ;;  %406 = vst.msk [vmem:[%s1032_s22 + $0x50] sm:$0xff] %vm395_vm0, %v389_v22 }
  0xe5   : > { %v790_v25 = vpop.eup %789  ;;  %v392_v26 = vmul.f32 %v788_v24, %v1089_v21  ;;  %v435_v27 = vpop.xlane.xlu1 %434 }
  0xe6   : > { %v433_v28 = vpop.xlane.xlu0 %432  ;;  %v1099_v29 = vpop.eup %791  ;;  %v391_v30 = vmul.f32 %v790_v25, %v1092_v23  ;;  %803 = vrsqrt.f32 %v435_v27 }
  0xe7   : > { %v1102_v31 = vpop.eup %793  ;;  %409 = vst.msk [vmem:[%s1032_s22 + $0x68] sm:$0xff] %vm395_vm0, %v392_v26  ;;  %805 = vrsqrt.f32 %v433_v28 }
  0xe8   : > { %v796_v32 = vpop.eup %795  ;;  %408 = vst.msk [vmem:[%s1032_s22 + $0x60] sm:$0xff] %vm395_vm0, %v391_v30 }
  0xe9   : > { %v798_v33 = vpop.eup %797  ;;  %v394_v34 = vmul.f32 %v796_v32, %v1099_v29  ;;  %v439_v35 = vpop.xlane.xlu1 %438 }
  0xea   : > { %v437_v36 = vpop.xlane.xlu0 %436  ;;  %v393_v37 = vmul.f32 %v798_v33, %v1102_v31  ;;  %807 = vrsqrt.f32 %v439_v35 }
  0xeb   : > { %411 = vst.msk [vmem:[%s1032_s22 + $0x78] sm:$0xff] %vm395_vm0, %v394_v34  ;;  %809 = vrsqrt.f32 %v437_v36 }
  0xec   : > { %v800_v40 = vpop.eup %799  ;;  %410 = vst.msk [vmem:[%s1032_s22 + $0x70] sm:$0xff] %vm395_vm0, %v393_v37 }
  0xed   : > { %v802_v41 = vpop.eup %801  ;;  %v477_v42 = vmul.f32 %v800_v40, %v1026_v39  ;;  %v443_v43 = vpop.xlane.xlu1 %442 }
  0xee   : > { %v441_v44 = vpop.xlane.xlu0 %440  ;;  %v476_v46 = vmul.f32 %v802_v41, %v1024_v38  ;;  %811 = vrsqrt.f32 %v443_v43 }
  0xef   : > { %494 = vst.msk [vmem:[%s1032_s22 + $0x8] sm:$0xff] %vm492_vm1, %v477_v42  ;;  %813 = vrsqrt.f32 %v441_v44 }
  0xf0   : > { %v804_v48 = vpop.eup %803  ;;  %493 = vst.msk [vmem:[%s1032_s22] sm:$0xff] %vm492_vm1, %v476_v46 }
  0xf1   : > { %v806_v49 = vpop.eup %805  ;;  %v479_v50 = vmul.f32 %v804_v48, %v1038_v47  ;;  %v447_v51 = vpop.xlane.xlu1 %446 }
  0xf2   : > { %v445_v52 = vpop.xlane.xlu0 %444  ;;  %v478_v54 = vmul.f32 %v806_v49, %v1035_v45  ;;  %815 = vrsqrt.f32 %v447_v51 }
  0xf3   : > { %496 = vst.msk [vmem:[%s1032_s22 + $0x18] sm:$0xff] %vm492_vm1, %v479_v50  ;;  %817 = vrsqrt.f32 %v445_v52 }
  0xf4   : > { %v808_v56 = vpop.eup %807  ;;  %495 = vst.msk [vmem:[%s1032_s22 + $0x10] sm:$0xff] %vm492_vm1, %v478_v54 }
  0xf5   : > { %v810_v57 = vpop.eup %809  ;;  %v481_v58 = vmul.f32 %v808_v56, %v1045_v53  ;;  %v451_v59 = vpop.xlane.xlu1 %450 }
  0xf6   : > { %v449_v60 = vpop.xlane.xlu0 %448  ;;  %v480_v62 = vmul.f32 %v810_v57, %v1048_v55  ;;  %819 = vrsqrt.f32 %v451_v59 }
  0xf7   : > { %498 = vst.msk [vmem:[%s1032_s22 + $0x28] sm:$0xff] %vm492_vm1, %v481_v58  ;;  %821 = vrsqrt.f32 %v449_v60 }
  0xf8   : > { %v812_v0 = vpop.eup %811  ;;  %497 = vst.msk [vmem:[%s1032_s22 + $0x20] sm:$0xff] %vm492_vm1, %v480_v62 }
  0xf9   : > { %v814_v1 = vpop.eup %813  ;;  %v483_v2 = vmul.f32 %v812_v0, %v1055_v61  ;;  %v455_v3 = vpop.xlane.xlu1 %454 }
  0xfa   : > { %v453_v4 = vpop.xlane.xlu0 %452  ;;  %v482_v6 = vmul.f32 %v814_v1, %v1058_v63  ;;  %823 = vrsqrt.f32 %v455_v3 }
  0xfb   : > { %500 = vst.msk [vmem:[%s1032_s22 + $0x38] sm:$0xff] %vm492_vm1, %v483_v2  ;;  %825 = vrsqrt.f32 %v453_v4 }
  0xfc   : > { %v816_v8 = vpop.eup %815  ;;  %499 = vst.msk [vmem:[%s1032_s22 + $0x30] sm:$0xff] %vm492_vm1, %v482_v6 }
  0xfd   : > { %v818_v9 = vpop.eup %817  ;;  %v485_v10 = vmul.f32 %v816_v8, %v1067_v5  ;;  %v459_v11 = vpop.xlane.xlu1 %458 }
  0xfe   : > { %v457_v12 = vpop.xlane.xlu0 %456  ;;  %v484_v14 = vmul.f32 %v818_v9, %v1070_v7  ;;  %827 = vrsqrt.f32 %v459_v11 }
  0xff   : > { %502 = vst.msk [vmem:[%s1032_s22 + $0x48] sm:$0xff] %vm492_vm1, %v485_v10  ;;  %829 = vrsqrt.f32 %v457_v12 }
 0x100   : > { %v820_v16 = vpop.eup %819  ;;  %501 = vst.msk [vmem:[%s1032_s22 + $0x40] sm:$0xff] %vm492_vm1, %v484_v14 }
 0x101   : > { %v822_v17 = vpop.eup %821  ;;  %v487_v18 = vmul.f32 %v820_v16, %v1079_v13  ;;  %v512_v19 = vpop.xlane.xlu1 %511 }
 0x102   : > { %v510_v20 = vpop.xlane.xlu0 %509  ;;  %v486_v22 = vmul.f32 %v822_v17, %v1082_v15  ;;  %831 = vrsqrt.f32 %v512_v19 }
 0x103   : > { %504 = vst.msk [vmem:[%s1032_s22 + $0x58] sm:$0xff] %vm492_vm1, %v487_v18  ;;  %833 = vrsqrt.f32 %v510_v20 }
 0x104   : > { %v824_v24 = vpop.eup %823  ;;  %503 = vst.msk [vmem:[%s1032_s22 + $0x50] sm:$0xff] %vm492_vm1, %v486_v22 }
 0x105   : > { %v826_v25 = vpop.eup %825  ;;  %v489_v26 = vmul.f32 %v824_v24, %v1089_v21  ;;  %v516_v27 = vpop.xlane.xlu1 %515 }
 0x106   : > { %v514_v28 = vpop.xlane.xlu0 %513  ;;  %v488_v30 = vmul.f32 %v826_v25, %v1092_v23  ;;  %835 = vrsqrt.f32 %v516_v27 }
 0x107   : > { %506 = vst.msk [vmem:[%s1032_s22 + $0x68] sm:$0xff] %vm492_vm1, %v489_v26  ;;  %837 = vrsqrt.f32 %v514_v28 }
 0x108   : > { %v828_v32 = vpop.eup %827  ;;  %505 = vst.msk [vmem:[%s1032_s22 + $0x60] sm:$0xff] %vm492_vm1, %v488_v30 }
 0x109   : > { %v830_v33 = vpop.eup %829  ;;  %v491_v34 = vmul.f32 %v828_v32, %v1099_v29  ;;  %v520_v35 = vpop.xlane.xlu1 %519 }
 0x10a   : > { %v518_v36 = vpop.xlane.xlu0 %517  ;;  %v490_v37 = vmul.f32 %v830_v33, %v1102_v31  ;;  %839 = vrsqrt.f32 %v520_v35 }
 0x10b   : > { %508 = vst.msk [vmem:[%s1032_s22 + $0x78] sm:$0xff] %vm492_vm1, %v491_v34  ;;  %841 = vrsqrt.f32 %v518_v36 }
 0x10c   : > { %v832_v40 = vpop.eup %831  ;;  %507 = vst.msk [vmem:[%s1032_s22 + $0x70] sm:$0xff] %vm492_vm1, %v490_v37 }
 0x10d   : > { %v834_v41 = vpop.eup %833  ;;  %v558_v42 = vmul.f32 %v832_v40, %v1026_v39  ;;  %v524_v43 = vpop.xlane.xlu1 %523 }
 0x10e   : > { %v522_v44 = vpop.xlane.xlu0 %521  ;;  %v557_v46 = vmul.f32 %v834_v41, %v1024_v38  ;;  %843 = vrsqrt.f32 %v524_v43 }
 0x10f   : > { %575 = vst.msk [vmem:[%s1032_s22 + $0x8] sm:$0xff] %vm573_vm2, %v558_v42  ;;  %845 = vrsqrt.f32 %v522_v44 }
 0x110   : > { %v836_v48 = vpop.eup %835  ;;  %574 = vst.msk [vmem:[%s1032_s22] sm:$0xff] %vm573_vm2, %v557_v46 }
 0x111   : > { %v838_v49 = vpop.eup %837  ;;  %v560_v50 = vmul.f32 %v836_v48, %v1038_v47  ;;  %v528_v51 = vpop.xlane.xlu1 %527 }
 0x112   : > { %v526_v52 = vpop.xlane.xlu0 %525  ;;  %v559_v39 = vmul.f32 %v838_v49, %v1035_v45  ;;  %847 = vrsqrt.f32 %v528_v51 }
 0x113   : > { %577 = vst.msk [vmem:[%s1032_s22 + $0x18] sm:$0xff] %vm573_vm2, %v560_v50  ;;  %849 = vrsqrt.f32 %v526_v52 }
 0x114   : > { %v840_v38 = vpop.eup %839  ;;  %576 = vst.msk [vmem:[%s1032_s22 + $0x10] sm:$0xff] %vm573_vm2, %v559_v39 }
 0x115   : > { %v842_v54 = vpop.eup %841  ;;  %v562_v56 = vmul.f32 %v840_v38, %v1045_v53  ;;  %v532_v57 = vpop.xlane.xlu1 %531 }
 0x116   : > { %v530_v58 = vpop.xlane.xlu0 %529  ;;  %v561_v47 = vmul.f32 %v842_v54, %v1048_v55  ;;  %851 = vrsqrt.f32 %v532_v57 }
 0x117   : > { %579 = vst.msk [vmem:[%s1032_s22 + $0x28] sm:$0xff] %vm573_vm2, %v562_v56  ;;  %853 = vrsqrt.f32 %v530_v58 }
 0x118   : > { %v844_v45 = vpop.eup %843  ;;  %578 = vst.msk [vmem:[%s1032_s22 + $0x20] sm:$0xff] %vm573_vm2, %v561_v47 }
 0x119   : > { %v846_v59 = vpop.eup %845  ;;  %v564_v60 = vmul.f32 %v844_v45, %v1055_v61  ;;  %v536_v62 = vpop.xlane.xlu1 %535 }
 0x11a   : > { %v534_v0 = vpop.xlane.xlu0 %533  ;;  %v563_v53 = vmul.f32 %v846_v59, %v1058_v63  ;;  %855 = vrsqrt.f32 %v536_v62 }
 0x11b   : > { %581 = vst.msk [vmem:[%s1032_s22 + $0x38] sm:$0xff] %vm573_vm2, %v564_v60  ;;  %857 = vrsqrt.f32 %v534_v0 }
 0x11c   : > { %v848_v55 = vpop.eup %847  ;;  %580 = vst.msk [vmem:[%s1032_s22 + $0x30] sm:$0xff] %vm573_vm2, %v563_v53 }
 0x11d   : > { %v850_v1 = vpop.eup %849  ;;  %v566_v2 = vmul.f32 %v848_v55, %v1067_v5  ;;  %v540_v3 = vpop.xlane.xlu1 %539 }
 0x11e   : > { %v538_v4 = vpop.xlane.xlu0 %537  ;;  %v565_v61 = vmul.f32 %v850_v1, %v1070_v7  ;;  %859 = vrsqrt.f32 %v540_v3 }
 0x11f   : > { %583 = vst.msk [vmem:[%s1032_s22 + $0x48] sm:$0xff] %vm573_vm2, %v566_v2  ;;  %861 = vrsqrt.f32 %v538_v4 }
 0x120   : > { %v852_v63 = vpop.eup %851  ;;  %582 = vst.msk [vmem:[%s1032_s22 + $0x40] sm:$0xff] %vm573_vm2, %v565_v61 }
 0x121   : > { %v854_v6 = vpop.eup %853  ;;  %v568_v8 = vmul.f32 %v852_v63, %v1079_v13 }
 0x122   : > { %v567_v5 = vmul.f32 %v854_v6, %v1082_v15 }
 0x123   : > { %585 = vst.msk [vmem:[%s1032_s22 + $0x58] sm:$0xff] %vm573_vm2, %v568_v8 }
 0x124   : > { %v856_v9 = vpop.eup %855  ;;  %584 = vst.msk [vmem:[%s1032_s22 + $0x50] sm:$0xff] %vm573_vm2, %v567_v5 }
 0x125   : > { %v858_v7 = vpop.eup %857  ;;  %v570_v10 = vmul.f32 %v856_v9, %v1089_v21 }
 0x126   : > { %v569_v11 = vmul.f32 %v858_v7, %v1092_v23 }
 0x127   : > { %587 = vst.msk [vmem:[%s1032_s22 + $0x68] sm:$0xff] %vm573_vm2, %v570_v10 }
 0x128   : > { %v860_v12 = vpop.eup %859  ;;  %586 = vst.msk [vmem:[%s1032_s22 + $0x60] sm:$0xff] %vm573_vm2, %v569_v11 }
 0x129   : > { %v862_v14 = vpop.eup %861  ;;  %v572_v13 = vmul.f32 %v860_v12, %v1099_v29 }
 0x12a   : > { %v571_v15 = vmul.f32 %v862_v14, %v1102_v31 }
 0x12b   : > { %589 = vst.msk [vmem:[%s1032_s22 + $0x78] sm:$0xff] %vm573_vm2, %v572_v13 }
 0x12c   : > { %588 = vst.msk [vmem:[%s1032_s22 + $0x70] sm:$0xff] %vm573_vm2, %v571_v15 }
 0x12d PF: > { %s12_s11 = sadd.s32 1, %s885_s11   ;;  %s1222_s9 = smov %s881_s10 }
 0x12e   : > { %p9_p5 = scmp.ge.s32.totalorder %s12_s11, 4   ;;  %s1223_s10 = smov %s1225_s12 }
 0x130   :  { %11 = sbr.rel (!%p9_p5) target bundleno = 2 (0x2), region = 61 }

// kernel: loss_kernel_matching_perpixel_ms.3
= control target key start
LH: loop header
LB: loop body
LE: loop exit
PB: predicated region body
PF: predicated region fallthrough
CT: control target
= control target key end

     0   :  { %s964_s12 = smov 0   ;;  %s966_s13 = smov 0   ;;  %s1587_s0 = inlined_call_operand.vmem [shape: f32[2,128,128], index: 0, kind: input, shape index: {}]   ;;  %s1588_s1 = inlined_call_operand.vmem [shape: f32[2,128,128], index: 1, kind: input, shape index: {}]   ;;  %s1589_s2 = inlined_call_operand.vmem [shape: f32[2,3,128], index: 2, kind: input, shape index: {}]   ;;  %s1590_s3 = inlined_call_operand.vmem [shape: f32[2,128,1], index: 3, kind: output, shape index: {}]  }
   0x1   :  { %s968_s14 = smov 0  }
   0x2 LB: > { %s25_s15 = sadd.s32 1, %s938_s13  ;;  %p848_p0 = scmp.ge.s32.totalorder %s942_s14, 1  ;;  %s942_s14 = sphi %s968_s14, %s13_s14   ;;  %s938_s13 = sphi %s966_s13, %s1596_s13   ;;  %s934_s12 = sphi %s964_s12, %s1595_s12  }
   0x3   : > { %p27_p1 = scmp.ge.s32.totalorder %s25_s15, 2  ;;  %p184_p2 = scmp.lt.s32.totalorder %s942_s14, 3 }
   0x5   : > { %s1598_s15 = smov (%p27_p1, %s25_s15), 0  ;;  %p185_p3 = pnand %p848_p0, %p184_p2 }
   0x6   : > { %p230_p4 = scmp.lt.s32.totalorder (!%p185_p3), %s934_s12, 1 }
   0x7   : > { %188 = sbr.rel (%p185_p3) target bundleno = 263 (0x107), region = 32 }
   0xe   : > { %s1600_s12 = smov (!%p230_p4, %s934_s12), 1 }
   0xf   : > { %s982_s16 = sshll.u32 %s1600_s12, 7  ;;  %s853_s17 = sshll.u32 %s1600_s12, 2 }
  0x10   : > { %s988_s20 = scalar_lea.vmem %s1587_s0, %s982_s16  ;;  %s994_s23 = scalar_lea.vmem %s1588_s1, %s982_s16 }
  0x11   : > { %s999_s26 = scalar_lea.vmem %s1589_s2, %s853_s17  ;;  %v1002_v0 = vld [vmem:[%s988_s20 + $0x10] sm:$0xff]  ;;  %v1008_v2 = vld [vmem:[%s988_s20] sm:$0xff]  ;;  %v1019_v6 = vld [vmem:[%s988_s20 + $0x18] sm:$0xff]  ;;  %s1525_s29 = scalar_lea.vmem %s1590_s3, %s982_s16 }
  0x12   : > { %v1005_v1 = vld [vmem:[%s994_s23 + $0x10] sm:$0xff]  ;;  %v1013_v4 = vld [vmem:[%s999_s26] ss:$0 sm:$0xff]  ;;  %v1024_v8 = vld [vmem:[%s994_s23 + $0x18] sm:$0xff]  ;;  %888 = vrsqrt.f32 %v1008_v2  ;;  %v380_v38 = vmul.f32 %v1008_v2, %v1008_v2  ;;  %v383_v43 = vmul.f32 %v1019_v6, %v1019_v6  ;;  %v382_v44 = vmul.f32 %v1002_v0, %v1002_v0 }
  0x13   : > { %v297_v3 = vmul.f32 %v1005_v1, %v1002_v0  ;;  %v1016_v5 = vld [vmem:[%s994_s23] sm:$0xff]  ;;  %v1027_v9 = vld [vmem:[%s988_s20 + $0x8] sm:$0xff]  ;;  %v298_v12 = vmul.f32 %v1024_v8, %v1019_v6  ;;  %v1057_v23 = vld [vmem:[%s988_s20 + $0x38] sm:$0xff]  ;;  %vm499_vm0 = vcmp.eq.f32.partialorder %v1008_v2, inf  ;;  %vm501_vm1 = vcmp.eq.f32.partialorder %v1008_v2, 0.0 }
  0x14   : > { %v295_v7 = vmul.f32 %v1016_v5, %v1008_v2  ;;  %v1030_v10 = vld [vmem:[%s994_s23 + $0x8] sm:$0xff]  ;;  %v1044_v16 = vld [vmem:[%s988_s20 + $0x20] sm:$0xff]  ;;  %v1060_v24 = vld [vmem:[%s994_s23 + $0x38] sm:$0xff]  ;;  %v381_v42 = vmul.f32 %v1027_v9, %v1027_v9  ;;  %v396_v60 = vmul.f32 %v380_v38, %v1016_v5  ;;  %v399_v63 = vmul.f32 %v383_v43, %v1024_v8 }
  0x15   : > { %v318_v11 = vmul.f32 %v1013_v4, %v297_v3  ;;  %v296_v13 = vmul.f32 %v1030_v10, %v1027_v9  ;;  %v1038_v14 = vld [vmem:[%s988_s20 + $0x28] sm:$0xff]  ;;  %v1048_v18 = vld [vmem:[%s994_s23 + $0x20] sm:$0xff]  ;;  %v319_v19 = vmul.f32 %v1013_v4, %v298_v12  ;;  %v1063_v25 = vld [vmem:[%s988_s20 + $0x30] sm:$0xff]  ;;  %v302_v29 = vmul.f32 %v1060_v24, %v1057_v23 }
  0x16   : > { %v1041_v15 = vld [vmem:[%s994_s23 + $0x28] sm:$0xff]  ;;  %v316_v17 = vmul.f32 %v1013_v4, %v295_v7  ;;  %v299_v22 = vmul.f32 %v1048_v18, %v1044_v16  ;;  %v1066_v26 = vld [vmem:[%s994_s23 + $0x30] sm:$0xff]  ;;  %v1079_v31 = vld [vmem:[%s988_s20 + $0x40] sm:$0xff]  ;;  %v385_v55 = vmul.f32 %v1038_v14, %v1038_v14  ;;  %v384_v56 = vmul.f32 %v1044_v16, %v1044_v16 }
  0x17   : > { %336 = vadd.xlane.f32.xlu1 %v318_v11  ;;  %v300_v20 = vmul.f32 %v1041_v15, %v1038_v14  ;;  %v317_v21 = vmul.f32 %v1013_v4, %v296_v13  ;;  %v1069_v27 = vld [vmem:[%s988_s20 + $0x48] sm:$0xff]  ;;  %v1082_v32 = vld [vmem:[%s994_s23 + $0x40] sm:$0xff]  ;;  %v301_v34 = vmul.f32 %v1066_v26, %v1063_v25  ;;  %v1088_v35 = vld [vmem:[%s988_s20 + $0x58] sm:$0xff]  ;;  %v323_v50 = vmul.f32 %v1013_v4, %v302_v29 }
  0x18   : > { %332 = vadd.xlane.f32.xlu0 %v316_v17  ;;  %v1076_v30 = vld [vmem:[%s994_s23 + $0x48] sm:$0xff]  ;;  %v320_v33 = vmul.f32 %v1013_v4, %v299_v22  ;;  %v1091_v36 = vld [vmem:[%s994_s23 + $0x58] sm:$0xff]  ;;  %v1094_v37 = vld [vmem:[%s988_s20 + $0x50] sm:$0xff]  ;;  %v303_v46 = vmul.f32 %v1082_v32, %v1079_v31  ;;  %v397_v62 = vmul.f32 %v381_v42, %v1030_v10  ;;  %v398_v3 = vmul.f32 %v382_v44, %v1005_v1 }
  0x19   : > { %v321_v28 = vmul.f32 %v1013_v4, %v300_v20  ;;  %v1099_v39 = vld [vmem:[%s994_s23 + $0x50] sm:$0xff]  ;;  %v1102_v40 = vld [vmem:[%s988_s20 + $0x68] sm:$0xff]  ;;  %v304_v45 = vmul.f32 %v1076_v30, %v1069_v27  ;;  %v1118_v47 = vld [vmem:[%s988_s20 + $0x60] sm:$0xff]  ;;  %v306_v51 = vmul.f32 %v1091_v36, %v1088_v35  ;;  %v322_v57 = vmul.f32 %v1013_v4, %v301_v34 }
  0x1a   : > { %v1105_v41 = vld [vmem:[%s994_s23 + $0x68] sm:$0xff]  ;;  %v1121_v48 = vld [vmem:[%s994_s23 + $0x60] sm:$0xff]  ;;  %v1124_v49 = vld [vmem:[%s988_s20 + $0x78] sm:$0xff]  ;;  %v305_v58 = vmul.f32 %v1099_v39, %v1094_v37  ;;  %v324_v11 = vmul.f32 %v1013_v4, %v303_v46  ;;  %v401_v20 = vmul.f32 %v385_v55, %v1041_v15  ;;  %v387_v22 = vmul.f32 %v1057_v23, %v1057_v23 }
  0x1b   : > { %338 = vadd.xlane.f32.xlu1 %v319_v19  ;;  %v1131_v52 = vld [vmem:[%s994_s23 + $0x78] sm:$0xff]  ;;  %v1134_v53 = vld [vmem:[%s988_s20 + $0x70] sm:$0xff]  ;;  %v308_v59 = vmul.f32 %v1105_v41, %v1102_v40  ;;  %v307_v61 = vmul.f32 %v1121_v48, %v1118_v47  ;;  %v325_v7 = vmul.f32 %v1013_v4, %v304_v45  ;;  %v1162_v17 = vld [vmem:[%s999_s26 + $0x1] ss:$0 sm:$0xff]  ;;  %v327_v19 = vmul.f32 %v1013_v4, %v306_v51 }
  0x1c   : > { %334 = vadd.xlane.f32.xlu0 %v317_v21  ;;  %v1137_v54 = vld [vmem:[%s994_s23 + $0x70] sm:$0xff]  ;;  %v310_v12 = vmul.f32 %v1131_v52, %v1124_v49  ;;  %v400_v21 = vmul.f32 %v384_v56, %v1048_v18  ;;  %v326_v29 = vmul.f32 %v1013_v4, %v305_v58  ;;  %v386_v34 = vmul.f32 %v1063_v25, %v1063_v25 }
  0x1d   : > { %v309_v13 = vmul.f32 %v1137_v54, %v1134_v53  ;;  %v389_v38 = vmul.f32 %v1069_v27, %v1069_v27  ;;  %v328_v42 = vmul.f32 %v1013_v4, %v307_v61  ;;  %v1177_v43 = vmul.f32 %v1162_v17, %v397_v62 }
  0x1e   : > { %v1180_v44 = vmul.f32 %v1162_v17, %v396_v60  ;;  %v388_v45 = vmul.f32 %v1079_v31, %v1079_v31  ;;  %v331_v46 = vmul.f32 %v1013_v4, %v310_v12  ;;  %v1189_v51 = vmul.f32 %v1162_v17, %v399_v63 }
  0x1f   : > { %342 = vadd.xlane.f32.xlu1 %v321_v28  ;;  %v889_v28 = vpop.eup %888  ;;  %v1192_v55 = vmul.f32 %v1162_v17, %v398_v3  ;;  %v403_v56 = vmul.f32 %v387_v22, %v1060_v24  ;;  %v390_v58 = vmul.f32 %v1094_v37, %v1094_v37  ;;  %v405_v60 = vmul.f32 %v389_v38, %v1076_v30 }
  0x20   : > { %340 = vadd.xlane.f32.xlu0 %v320_v33  ;;  %v329_v33 = vmul.f32 %v1013_v4, %v308_v59  ;;  %v498_v59 = vmul.f32 %v889_v28, %v1008_v2  ;;  %v502_v61 = vand.u32 2147483648, %v1008_v2  ;;  %890 = vrsqrt.f32 %v1019_v6 }
  0x21   : > { %v1205_v62 = vmul.f32 %v1162_v17, %v401_v20  ;;  %v1208_v63 = vmul.f32 %v1162_v17, %v400_v21  ;;  %v404_v3 = vmul.f32 %v388_v45, %v1082_v32  ;;  %v1220_v12 = vmul.f32 %v1118_v47, %v1118_v47 }
  0x22   : > { %892 = vrsqrt.f32 %v1002_v0  ;;  %v1232_v22 = vmul.f32 %v390_v58, %v1099_v39  ;;  %v1243_v38 = vmul.f32 %v1162_v17, %v405_v60  ;;  %vm520_vm2 = vcmp.eq.f32.partialorder %v1019_v6, inf }
  0x23   : > { %346 = vadd.xlane.f32.xlu1 %v323_v50  ;;  %v1186_v50 = vmul.f32 %v1013_v4, %v309_v13  ;;  %v402_v4 = vmul.f32 %v386_v34, %v1066_v26  ;;  %v1223_v13 = vld [vmem:[%s999_s26 + $0x2] ss:$0 sm:$0xff]  ;;  %894 = vrsqrt.f32 %v1027_v9  ;;  %v1237_v34 = vmul.f32 %v1162_v17, %v403_v56 }
  0x24   : > { %344 = vadd.xlane.f32.xlu0 %v322_v57  ;;  %v391_v57 = vmul.f32 %v1088_v35, %v1088_v35  ;;  %896 = vrsqrt.f32 %v1038_v14  ;;  %vm522_vm3 = vcmp.eq.f32.partialorder %v1019_v6, 0.0  ;;  %vm513_vm4 = vcmp.eq.f32.partialorder %v1002_v0, inf }
  0x25   : > { %898 = vrsqrt.f32 %v1044_v16  ;;  %vm515_vm5 = vcmp.eq.f32.partialorder %v1002_v0, 0.0  ;;  %vm534_vm6 = vcmp.eq.f32.partialorder %v1038_v14, inf  ;;  %vm536_vm7 = vcmp.eq.f32.partialorder %v1038_v14, 0.0 }
  0x26   : > { %v1229_v21 = vmul.f32 %v391_v57, %v1091_v36  ;;  %900 = vrsqrt.f32 %v1057_v23  ;;  %v537_v56 = vand.u32 2147483648, %v1038_v14  ;;  %vm527_vm8 = vcmp.eq.f32.partialorder %v1044_v16, inf }
  0x27   : > { %350 = vadd.xlane.f32.xlu1 %v325_v7  ;;  %v500_v7 = vsel %vm499_vm0, %v1008_v2, %v498_v59  ;;  %v1240_v2 = vmul.f32 %v1162_v17, %v402_v4  ;;  %902 = vrsqrt.f32 %v1063_v25  ;;  %vm529_vm9 = vcmp.eq.f32.partialorder %v1044_v16, 0.0 }
  0x28   : > { %348 = vadd.xlane.f32.xlu0 %v324_v11  ;;  %v1216_v11 = vmul.f32 %v1102_v40, %v1102_v40  ;;  %v503_v20 = vsel %vm501_vm1, %v502_v61, %v500_v7  ;;  %904 = vrsqrt.f32 %v1069_v27  ;;  %vm548_vm10 = vcmp.eq.f32.partialorder %v1057_v23, inf }
  0x29   : > { %v609_v28 = vmul.f32 %v503_v20, %v1016_v5  ;;  %v523_v5 = vand.u32 2147483648, %v1019_v6  ;;  %906 = vrsqrt.f32 %v1079_v31  ;;  %vm550_vm11 = vcmp.eq.f32.partialorder %v1057_v23, 0.0 }
  0x2a   : > { %v891_v57 = vpop.eup %890  ;;  %vm541_vm12 = vcmp.eq.f32.partialorder %v1063_v25, inf  ;;  %908 = vrsqrt.f32 %v1088_v35  ;;  %vm543_vm13 = vcmp.eq.f32.partialorder %v1063_v25, 0.0  ;;  %v544_v59 = vand.u32 2147483648, %v1063_v25 }
  0x2b   : > { %354 = vadd.xlane.f32.xlu1 %v327_v19  ;;  %v1247_v19 = vmul.f32 %v1162_v17, %v404_v3  ;;  %v1250_v45 = vmul.f32 %v1223_v13, %v609_v28  ;;  %v519_v58 = vmul.f32 %v891_v57, %v1019_v6  ;;  %v565_v60 = vand.u32 2147483648, %v1069_v27 }
  0x2c   : > { %352 = vadd.xlane.f32.xlu0 %v326_v29  ;;  %v516_v29 = vand.u32 2147483648, %v1002_v0  ;;  %v893_v4 = vpop.eup %892  ;;  %910 = vrsqrt.f32 %v1094_v37  ;;  %vm557_vm1 = vcmp.eq.f32.partialorder %v1079_v31, 0.0  ;;  %vm576_vm15 = vcmp.eq.f32.partialorder %v1088_v35, inf }
  0x2d   : > { %v521_v61 = vsel %vm520_vm2, %v1019_v6, %v519_v58  ;;  %v512_v3 = vmul.f32 %v893_v4, %v1002_v0  ;;  %vm578_vm0 = vcmp.eq.f32.partialorder %v1088_v35, 0.0  ;;  %v579_v28 = vand.u32 2147483648, %v1088_v35 }
  0x2e   : > { %v524_v20 = vsel %vm522_vm3, %v523_v5, %v521_v61  ;;  %vm569_vm14 = vcmp.eq.f32.partialorder %v1094_v37, inf  ;;  %912 = vrsqrt.f32 %v1102_v40  ;;  %vm571_vm2 = vcmp.eq.f32.partialorder %v1094_v37, 0.0 }
  0x2f   : > { %358 = vadd.xlane.f32.xlu1 %v329_v33  ;;  %v530_v33 = vand.u32 2147483648, %v1044_v16  ;;  %v612_v58 = vmul.f32 %v524_v20, %v1024_v8  ;;  %v514_v4 = vsel %vm513_vm4, %v1002_v0, %v512_v3  ;;  %v572_v5 = vand.u32 2147483648, %v1094_v37 }
  0x30   : > { %356 = vadd.xlane.f32.xlu0 %v328_v42  ;;  %v551_v42 = vand.u32 2147483648, %v1057_v23  ;;  %vm590_vm3 = vcmp.eq.f32.partialorder %v1102_v40, inf  ;;  %v593_v8 = vand.u32 2147483648, %v1102_v40  ;;  %914 = vrsqrt.f32 %v1118_v47 }
  0x31   : > { %vm592_vm4 = vcmp.eq.f32.partialorder %v1102_v40, 0.0  ;;  %916 = vrsqrt.f32 %v1124_v49 }
  0x32   : > { %918 = vrsqrt.f32 %v1134_v53 }
  0x33   : > { %362 = vadd.xlane.f32.xlu1 %v331_v46  ;;  %v1283_v46 = vpop.eup %894 }
  0x34   : > { %360 = vadd.xlane.f32.xlu0 %v1186_v50  ;;  %v897_v7 = vpop.eup %896  ;;  %v517_v50 = vsel %vm515_vm5, %v516_v29, %v514_v4  ;;  %vm583_vm5 = vcmp.eq.f32.partialorder %v1118_v47, inf }
  0x35   : > { %v899_v57 = vpop.eup %898  ;;  %v533_v6 = vmul.f32 %v897_v7, %v1038_v14  ;;  %v1314_v7 = vmul.f32 %v1223_v13, %v612_v58  ;;  %v611_v20 = vmul.f32 %v517_v50, %v1005_v1 }
  0x36   : > { %v901_v61 = vpop.eup %900 }
  0x37   : > { %435 = vadd.xlane.f32.xlu1 %v1177_v43  ;;  %v526_v43 = vmul.f32 %v899_v57, %v1044_v16  ;;  %v903_v3 = vpop.eup %902  ;;  %v547_v0 = vmul.f32 %v901_v61, %v1057_v23  ;;  %v1331_v50 = vmul.f32 %v1223_v13, %v611_v20 }
  0x38   : > { %433 = vadd.xlane.f32.xlu0 %v1180_v44  ;;  %v535_v44 = vsel %vm534_vm6, %v1038_v14, %v533_v6  ;;  %v905_v29 = vpop.eup %904  ;;  %v540_v58 = vmul.f32 %v903_v3, %v1063_v25  ;;  %vm1591_vm6 = vcmp.eq.f32.partialorder %v1069_v27, inf }
  0x39   : > { %v538_v57 = vsel %vm536_vm7, %v537_v56, %v535_v44  ;;  %v528_v4 = vsel %vm527_vm8, %v1044_v16, %v526_v43  ;;  %v907_v1 = vpop.eup %906  ;;  %v549_v56 = vsel %vm548_vm10, %v1057_v23, %v547_v0  ;;  %vm1592_vm7 = vcmp.eq.f32.partialorder %v1069_v27, 0.0 }
  0x3a   : > { %v614_v6 = vmul.f32 %v538_v57, %v1041_v15  ;;  %v531_v14 = vsel %vm529_vm9, %v530_v33, %v528_v4  ;;  %v909_v61 = vpop.eup %908  ;;  %v542_v3 = vsel %vm541_vm12, %v1063_v25, %v540_v58  ;;  %v561_v15 = vmul.f32 %v905_v29, %v1069_v27 }
  0x3b   : > { %439 = vadd.xlane.f32.xlu1 %v1189_v51  ;;  %v613_v43 = vmul.f32 %v531_v14, %v1048_v18  ;;  %v552_v51 = vsel %vm550_vm11, %v551_v42, %v549_v56  ;;  %v545_v20 = vsel %vm543_vm13, %v544_v59, %v542_v3  ;;  %v911_v18 = vpop.eup %910  ;;  %v575_v0 = vmul.f32 %v909_v61, %v1088_v35 }
  0x3c   : > { %437 = vadd.xlane.f32.xlu0 %v1192_v55  ;;  %v1348_v16 = vmul.f32 %v1223_v13, %v614_v6  ;;  %v616_v33 = vmul.f32 %v552_v51, %v1060_v24  ;;  %v554_v55 = vmul.f32 %v907_v1, %v1079_v31  ;;  %v615_v42 = vmul.f32 %v545_v20, %v1066_v26  ;;  %v913_v29 = vpop.eup %912 }
  0x3d   : > { %v1355_v23 = vmul.f32 %v1223_v13, %v613_v43  ;;  %v563_v44 = vsel %vm1591_vm6, %v1069_v27, %v561_v15  ;;  %vm1593_vm8 = vcmp.eq.f32.partialorder %v1079_v31, inf  ;;  %v568_v59 = vmul.f32 %v911_v18, %v1094_v37  ;;  %v915_v6 = vpop.eup %914 }
  0x3e   : > { %v1364_v24 = vmul.f32 %v1223_v13, %v616_v33  ;;  %v566_v25 = vsel %vm1592_vm7, %v565_v60, %v563_v44  ;;  %v556_v26 = vsel %vm1593_vm8, %v1079_v31, %v554_v55  ;;  %v1376_v57 = vmul.f32 %v1223_v13, %v615_v42  ;;  %v917_v55 = vpop.eup %916 }
  0x3f   : > { %443 = vadd.xlane.f32.xlu1 %v1205_v62  ;;  %v618_v62 = vmul.f32 %v566_v25, %v1076_v30  ;;  %v1594_v4 = vand.u32 2147483648, %v1079_v31  ;;  %v577_v60 = vsel %vm576_vm15, %v1088_v35, %v575_v0  ;;  %v589_v30 = vmul.f32 %v913_v29, %v1102_v40  ;;  %v919_v0 = vpop.eup %918 }
  0x40   : > { %441 = vadd.xlane.f32.xlu0 %v1208_v63  ;;  %v580_v1 = vsel %vm578_vm0, %v579_v28, %v577_v60  ;;  %v570_v63 = vsel %vm569_vm14, %v1094_v37, %v568_v59  ;;  %vm585_vm9 = vcmp.eq.f32.partialorder %v1118_v47, 0.0  ;;  %v582_v61 = vmul.f32 %v915_v6, %v1118_v47 }
  0x41   : > { %v559_v27 = vsel %vm557_vm1, %v1594_v4, %v556_v26  ;;  %v1394_v14 = vmul.f32 %v1223_v13, %v618_v62  ;;  %v620_v31 = vmul.f32 %v580_v1, %v1091_v36  ;;  %v573_v56 = vsel %vm571_vm2, %v572_v5, %v570_v63 }
  0x42   : > { %v617_v58 = vmul.f32 %v559_v27, %v1082_v32  ;;  %v619_v35 = vmul.f32 %v573_v56, %v1099_v39  ;;  %v591_v28 = vsel %vm590_vm3, %v1102_v40, %v589_v30  ;;  %v505_v39 = vmul.f32 %v1283_v46, %v1027_v9 }
  0x43   : > { %447 = vadd.xlane.f32.xlu1 %v1237_v34  ;;  %v1411_v36 = vmul.f32 %v1223_v13, %v620_v31  ;;  %v594_v37 = vsel %vm592_vm4, %v593_v8, %v591_v28  ;;  %v586_v34 = vand.u32 2147483648, %v1118_v47  ;;  %v409_v40 = vmul.f32 %v1216_v11, %v1105_v41 }
  0x44   : > { %v1402_v32 = vmul.f32 %v1223_v13, %v617_v58  ;;  %445 = vadd.xlane.f32.xlu0 %v1240_v2  ;;  %v1420_v5 = vmul.f32 %v1223_v13, %v619_v35  ;;  %v622_v43 = vmul.f32 %v594_v37, %v1105_v41  ;;  %v584_v2 = vsel %vm583_vm5, %v1118_v47, %v582_v61 }
  0x45   : > { %vm506_vm10 = vcmp.eq.f32.partialorder %v1027_v9, inf  ;;  %v587_v8 = vsel %vm585_vm9, %v586_v34, %v584_v2  ;;  %v428_v46 = vmul.f32 %v1162_v17, %v1229_v21  ;;  %v395_v51 = vmul.f32 %v1124_v49, %v1124_v49 }
  0x46   : > { %v643_v3 = vmul.f32 %v1223_v13, %v622_v43  ;;  %v621_v15 = vmul.f32 %v587_v8, %v1121_v48  ;;  %v427_v41 = vmul.f32 %v1162_v17, %v1232_v22  ;;  %v408_v47 = vmul.f32 %v1220_v12, %v1121_v48 }
  0x47   : > { %451 = vadd.xlane.f32.xlu1 %v1243_v38  ;;  %v394_v11 = vmul.f32 %v1134_v53, %v1134_v53  ;;  %v509_v21 = vand.u32 2147483648, %v1027_v9  ;;  %v507_v38 = vsel %vm506_vm10, %v1027_v9, %v505_v39  ;;  %vm508_vm11 = vcmp.eq.f32.partialorder %v1027_v9, 0.0 }
  0x48   : > { %449 = vadd.xlane.f32.xlu0 %v1247_v19  ;;  %v642_v33 = vmul.f32 %v1223_v13, %v621_v15  ;;  %v430_v19 = vmul.f32 %v1162_v17, %v409_v40  ;;  %v411_v20 = vmul.f32 %v395_v51, %v1131_v52  ;;  %v429_v22 = vmul.f32 %v1162_v17, %v408_v47 }
  0x49   : > { %v410_v48 = vmul.f32 %v394_v11, %v1137_v54  ;;  %v510_v12 = vsel %vm508_vm11, %v509_v21, %v507_v38  ;;  %vm604_vm12 = vcmp.eq.f32.partialorder %v1124_v49, inf  ;;  %v607_v18 = vand.u32 2147483648, %v1124_v49 }
  0x4a   : > { %v432_v9 = vmul.f32 %v1162_v17, %v411_v20  ;;  %v610_v42 = vmul.f32 %v510_v12, %v1030_v10  ;;  %v603_v44 = vmul.f32 %v917_v55, %v1124_v49  ;;  %vm606_vm13 = vcmp.eq.f32.partialorder %v1124_v49, 0.0 }
  0x4b   : > { %455 = vadd.xlane.f32.xlu1 %v428_v46  ;;  %v431_v25 = vmul.f32 %v1162_v17, %v410_v48  ;;  %vm597_vm14 = vcmp.eq.f32.partialorder %v1134_v53, inf  ;;  %v600_v26 = vand.u32 2147483648, %v1134_v53  ;;  %v596_v29 = vmul.f32 %v919_v0, %v1134_v53 }
  0x4c   : > { %453 = vadd.xlane.f32.xlu0 %v427_v41  ;;  %v605_v59 = vsel %vm604_vm12, %v1124_v49, %v603_v44  ;;  %vm599_vm15 = vcmp.eq.f32.partialorder %v1134_v53, 0.0  ;;  %v631_v10 = vmul.f32 %v1223_v13, %v610_v42  ;;  %vm710_vm0 = vcmask 7168  }
  0x4d   : > { %v608_v62 = vsel %vm606_vm13, %v607_v18, %v605_v59  ;;  %v598_v27 = vsel %vm597_vm14, %v1134_v53, %v596_v29 }
  0x4e   : > { %v624_v4 = vmul.f32 %v608_v62, %v1131_v52  ;;  %v601_v17 = vsel %vm599_vm15, %v600_v26, %v598_v27 }
  0x4f   : > { %459 = vadd.xlane.f32.xlu1 %v430_v19  ;;  %v623_v58 = vmul.f32 %v601_v17, %v1137_v54 }
  0x50   : > { %457 = vadd.xlane.f32.xlu0 %v429_v22  ;;  %v645_v60 = vmul.f32 %v1223_v13, %v624_v4 }
  0x51   : > { %v644_v49 = vmul.f32 %v1223_v13, %v623_v58 }
  0x53   : > { %463 = vadd.xlane.f32.xlu1 %v432_v9 }
  0x54   : > { %461 = vadd.xlane.f32.xlu0 %v431_v25 }
  0x57   : > { %648 = vadd.xlane.f32.xlu1 %v631_v10 }
  0x58   : > { %646 = vadd.xlane.f32.xlu0 %v1250_v45 }
  0x5b   : > { %652 = vadd.xlane.f32.xlu1 %v1314_v7 }
  0x5c   : > { %650 = vadd.xlane.f32.xlu0 %v1331_v50 }
  0x5f   : > { %656 = vadd.xlane.f32.xlu1 %v1348_v16 }
  0x60   : > { %654 = vadd.xlane.f32.xlu0 %v1355_v23 }
  0x63   : > { %660 = vadd.xlane.f32.xlu1 %v1364_v24 }
  0x64   : > { %658 = vadd.xlane.f32.xlu0 %v1376_v57 }
  0x67   : > { %664 = vadd.xlane.f32.xlu1 %v1394_v14 }
  0x68   : > { %662 = vadd.xlane.f32.xlu0 %v1402_v32 }
  0x6b   : > { %668 = vadd.xlane.f32.xlu1 %v1411_v36 }
  0x6c   : > { %666 = vadd.xlane.f32.xlu0 %v1420_v5 }
  0x6f   : > { %672 = vadd.xlane.f32.xlu1 %v643_v3 }
  0x70   : > { %670 = vadd.xlane.f32.xlu0 %v642_v33 }
  0x73   : > { %676 = vadd.xlane.f32.xlu1 %v645_v60 }
  0x74   : > { %674 = vadd.xlane.f32.xlu0 %v644_v49 }
  0xa4   : > { %v337_v52 = vpop.xlane.xlu1 %336 }
  0xa5   : > { %v333_v53 = vpop.xlane.xlu0 %332  ;;  %v366_v55 = vsub.f32 0.0, %v337_v52 }
  0xa6   : > { %v364_v41 = vsub.f32 0.0, %v333_v53 }
  0xa8   : > { %v339_v54 = vpop.xlane.xlu1 %338 }
  0xa9   : > { %v335_v13 = vpop.xlane.xlu0 %334  ;;  %v367_v48 = vsub.f32 0.0, %v339_v54 }
  0xaa   : > { %v365_v15 = vsub.f32 0.0, %v335_v13 }
  0xac   : > { %v343_v45 = vpop.xlane.xlu1 %342 }
  0xad   : > { %v1483_v7 = vpop.xlane.xlu0 %340  ;;  %v369_v62 = vsub.f32 0.0, %v343_v45 }
  0xae   : > { %v368_v4 = vsub.f32 0.0, %v1483_v7 }
  0xb0   : > { %v1485_v50 = vpop.xlane.xlu1 %346 }
  0xb1   : > { %v1487_v16 = vpop.xlane.xlu0 %344  ;;  %v371_v45 = vsub.f32 0.0, %v1485_v50 }
  0xb2   : > { %v370_v7 = vsub.f32 0.0, %v1487_v16 }
  0xb4   : > { %v1489_v23 = vpop.xlane.xlu1 %350 }
  0xb5   : > { %v1491_v24 = vpop.xlane.xlu0 %348 }
  0xb8   : > { %v1493_v57 = vpop.xlane.xlu1 %354 }
  0xb9   : > { %v1495_v1 = vpop.xlane.xlu0 %352 }
  0xbc   : > { %v1497_v63 = vpop.xlane.xlu1 %358 }
  0xbd   : > { %v1499_v30 = vpop.xlane.xlu0 %356 }
  0xc0   : > { %v1501_v6 = vpop.xlane.xlu1 %362 }
  0xc1   : > { %v1503_v14 = vpop.xlane.xlu0 %360 }
  0xc4   : > { %v436_v31 = vpop.xlane.xlu1 %435 }
  0xc5   : > { %v434_v56 = vpop.xlane.xlu0 %433  ;;  %v466_v46 = vsub.f32 0.0, %v436_v31 }
  0xc6   : > { %v465_v3 = vsub.f32 0.0, %v434_v56 }
  0xc7   : > { %v482_v11 = vmin.f32 %v365_v15, %v466_v46  ;;  %v372_v15 = vsub.f32 0.0, %v1491_v24 }
  0xc8   : > { %v440_v32 = vpop.xlane.xlu1 %439  ;;  %v481_v19 = vmin.f32 %v364_v41, %v465_v3  ;;  %v373_v3 = vsub.f32 0.0, %v1489_v23 }
  0xc9   : > { %v438_v35 = vpop.xlane.xlu0 %437  ;;  %v468_v21 = vsub.f32 0.0, %v440_v32 }
  0xca   : > { %v467_v20 = vsub.f32 0.0, %v438_v35 }
  0xcb   : > { %v484_v42 = vmin.f32 %v367_v48, %v468_v21 }
  0xcc   : > { %v444_v28 = vpop.xlane.xlu1 %443  ;;  %v483_v26 = vmin.f32 %v366_v55, %v467_v20  ;;  %v374_v20 = vsub.f32 0.0, %v1495_v1 }
  0xcd   : > { %v442_v61 = vpop.xlane.xlu0 %441  ;;  %v470_v44 = vsub.f32 0.0, %v444_v28 }
  0xce   : > { %v469_v59 = vsub.f32 0.0, %v442_v61 }
  0xcf   : > { %v486_v60 = vmin.f32 %v369_v62, %v470_v44  ;;  %v376_v44 = vsub.f32 0.0, %v1499_v30  ;;  %v379_v30 = vsub.f32 0.0, %v1501_v6 }
  0xd0   : > { %v448_v36 = vpop.xlane.xlu1 %447  ;;  %v485_v53 = vmin.f32 %v368_v4, %v469_v59  ;;  %v378_v4 = vsub.f32 0.0, %v1503_v14 }
  0xd1   : > { %v446_v37 = vpop.xlane.xlu0 %445  ;;  %v472_v58 = vsub.f32 0.0, %v448_v36 }
  0xd2   : > { %v471_v54 = vsub.f32 0.0, %v446_v37 }
  0xd3   : > { %v488_v35 = vmin.f32 %v371_v45, %v472_v58 }
  0xd4   : > { %v1505_v34 = vpop.xlane.xlu1 %451  ;;  %v487_v46 = vmin.f32 %v370_v7, %v471_v54 }
  0xd5   : > { %v1507_v39 = vpop.xlane.xlu0 %449  ;;  %v474_v28 = vsub.f32 0.0, %v1505_v34 }
  0xd6   : > { %v473_v37 = vsub.f32 0.0, %v1507_v39 }
  0xd8   : > { %v1509_v5 = vpop.xlane.xlu1 %455 }
  0xd9   : > { %v1511_v43 = vpop.xlane.xlu0 %453  ;;  %v476_v34 = vsub.f32 0.0, %v1509_v5 }
  0xda   : > { %v475_v39 = vsub.f32 0.0, %v1511_v43 }
  0xdc   : > { %v1513_v2 = vpop.xlane.xlu1 %459 }
  0xdd   : > { %v1515_v40 = vpop.xlane.xlu0 %457  ;;  %v478_v5 = vsub.f32 0.0, %v1513_v2 }
  0xde   : > { %v477_v43 = vsub.f32 0.0, %v1515_v40 }
  0xe0   : > { %v1517_v8 = vpop.xlane.xlu1 %463  ;;  %v493_v40 = vmin.f32 %v376_v44, %v477_v43 }
  0xe1   : > { %v1519_v51 = vpop.xlane.xlu0 %461 }
  0xe2   : > { %v479_v62 = vsub.f32 0.0, %v1519_v51 }
  0xe4   : > { %v649_v47 = vpop.xlane.xlu1 %648 }
  0xe5   : > { %v679_v38 = vsub.f32 0.0, %v649_v47  ;;  %v647_v33 = vpop.xlane.xlu0 %646 }
  0xe6   : > { %v678_v22 = vsub.f32 0.0, %v647_v33  ;;  %v489_v33 = vmin.f32 %v372_v15, %v473_v37 }
  0xe7   : > { %v695_v12 = vmin.f32 %v482_v11, %v679_v38  ;;  %v490_v11 = vmin.f32 %v373_v3, %v474_v28 }
  0xe8   : > { %v694_v18 = vmin.f32 %v481_v19, %v678_v22  ;;  %v653_v9 = vpop.xlane.xlu1 %652  ;;  %v375_v19 = vsub.f32 0.0, %v1493_v57 }
  0xe9   : > { %712 = vst.msk [vmem:[%s1525_s29 + $0x8] sm:$0xff] %vm710_vm0, %v695_v12  ;;  %v681_v0 = vsub.f32 0.0, %v653_v9  ;;  %v651_v25 = vpop.xlane.xlu0 %650  ;;  %v491_v9 = vmin.f32 %v374_v20, %v475_v39 }
  0xea   : > { %711 = vst.msk [vmem:[%s1525_s29] sm:$0xff] %vm710_vm0, %v694_v18  ;;  %v680_v29 = vsub.f32 0.0, %v651_v25  ;;  %v492_v12 = vmin.f32 %v375_v19, %v476_v34 }
  0xeb   : > { %v697_v10 = vmin.f32 %v484_v42, %v681_v0  ;;  %v377_v42 = vsub.f32 0.0, %v1497_v63 }
  0xec   : > { %v696_v27 = vmin.f32 %v483_v26, %v680_v29  ;;  %v657_v17 = vpop.xlane.xlu1 %656  ;;  %v480_v26 = vsub.f32 0.0, %v1517_v8 }
  0xed   : > { %714 = vst.msk [vmem:[%s1525_s29 + $0x18] sm:$0xff] %vm710_vm0, %v697_v10  ;;  %v683_v49 = vsub.f32 0.0, %v657_v17  ;;  %v655_v52 = vpop.xlane.xlu0 %654  ;;  %v494_v2 = vmin.f32 %v377_v42, %v478_v5 }
  0xee   : > { %713 = vst.msk [vmem:[%s1525_s29 + $0x10] sm:$0xff] %vm710_vm0, %v696_v27  ;;  %v682_v13 = vsub.f32 0.0, %v655_v52  ;;  %v496_v17 = vmin.f32 %v379_v30, %v480_v26 }
  0xef   : > { %v699_v31 = vmin.f32 %v486_v60, %v683_v49  ;;  %v495_v49 = vmin.f32 %v378_v4, %v479_v62 }
  0xf0   : > { %v698_v56 = vmin.f32 %v485_v53, %v682_v13  ;;  %v661_v32 = vpop.xlane.xlu1 %660 }
  0xf1   : > { %716 = vst.msk [vmem:[%s1525_s29 + $0x28] sm:$0xff] %vm710_vm0, %v699_v31  ;;  %v685_v61 = vsub.f32 0.0, %v661_v32  ;;  %v659_v36 = vpop.xlane.xlu0 %658 }
  0xf2   : > { %715 = vst.msk [vmem:[%s1525_s29 + $0x20] sm:$0xff] %vm710_vm0, %v698_v56  ;;  %v684_v50 = vsub.f32 0.0, %v659_v36 }
  0xf3   : > { %v701_v16 = vmin.f32 %v488_v35, %v685_v61 }
  0xf4   : > { %v700_v41 = vmin.f32 %v487_v46, %v684_v50  ;;  %v665_v47 = vpop.xlane.xlu1 %664 }
  0xf5   : > { %718 = vst.msk [vmem:[%s1525_s29 + $0x38] sm:$0xff] %vm710_vm0, %v701_v16  ;;  %v687_v21 = vsub.f32 0.0, %v665_v47  ;;  %v663_v38 = vpop.xlane.xlu0 %662 }
  0xf6   : > { %717 = vst.msk [vmem:[%s1525_s29 + $0x30] sm:$0xff] %vm710_vm0, %v700_v41  ;;  %v686_v23 = vsub.f32 0.0, %v663_v38 }
  0xf7   : > { %v703_v24 = vmin.f32 %v490_v11, %v687_v21 }
  0xf8   : > { %v702_v22 = vmin.f32 %v489_v33, %v686_v23  ;;  %v669_v48 = vpop.xlane.xlu1 %668 }
  0xf9   : > { %720 = vst.msk [vmem:[%s1525_s29 + $0x48] sm:$0xff] %vm710_vm0, %v703_v24  ;;  %v689_v55 = vsub.f32 0.0, %v669_v48  ;;  %v667_v18 = vpop.xlane.xlu0 %666 }
  0xfa   : > { %719 = vst.msk [vmem:[%s1525_s29 + $0x40] sm:$0xff] %vm710_vm0, %v702_v22  ;;  %v688_v57 = vsub.f32 0.0, %v667_v18 }
  0xfb   : > { %v705_v1 = vmin.f32 %v492_v12, %v689_v55 }
  0xfc   : > { %v704_v0 = vmin.f32 %v491_v9, %v688_v57  ;;  %v673_v25 = vpop.xlane.xlu1 %672 }
  0xfd   : > { %722 = vst.msk [vmem:[%s1525_s29 + $0x58] sm:$0xff] %vm710_vm0, %v705_v1  ;;  %v691_v59 = vsub.f32 0.0, %v673_v25  ;;  %v671_v29 = vpop.xlane.xlu0 %670 }
  0xfe   : > { %721 = vst.msk [vmem:[%s1525_s29 + $0x50] sm:$0xff] %vm710_vm0, %v704_v0  ;;  %v690_v63 = vsub.f32 0.0, %v671_v29 }
  0xff   : > { %v707_v10 = vmin.f32 %v494_v2, %v691_v59 }
 0x100   : > { %v706_v27 = vmin.f32 %v493_v40, %v690_v63  ;;  %v677_v8 = vpop.xlane.xlu1 %676 }
 0x101   : > { %724 = vst.msk [vmem:[%s1525_s29 + $0x68] sm:$0xff] %vm710_vm0, %v707_v10  ;;  %v693_v60 = vsub.f32 0.0, %v677_v8  ;;  %v675_v58 = vpop.xlane.xlu0 %674 }
 0x102   : > { %723 = vst.msk [vmem:[%s1525_s29 + $0x60] sm:$0xff] %vm710_vm0, %v706_v27  ;;  %v692_v51 = vsub.f32 0.0, %v675_v58 }
 0x103   : > { %v709_v52 = vmin.f32 %v496_v17, %v693_v60 }
 0x104   : > { %v708_v53 = vmin.f32 %v495_v49, %v692_v51 }
 0x105   : > { %726 = vst.msk [vmem:[%s1525_s29 + $0x78] sm:$0xff] %vm710_vm0, %v709_v52 }
 0x106   : > { %725 = vst.msk [vmem:[%s1525_s29 + $0x70] sm:$0xff] %vm710_vm0, %v708_v53 }
 0x107 PF: > { %s13_s14 = sadd.s32 1, %s942_s14   ;;  %s1595_s12 = smov %s938_s13 }
 0x108   : > { %p10_p5 = scmp.ge.s32.totalorder %s13_s14, 4   ;;  %s1596_s13 = smov %s1598_s15 }
 0x10a   :  { %12 = sbr.rel (!%p10_p5) target bundleno = 2 (0x2), region = 68 }

</bundles_post_ra>
